<compile_context>
chip_gen: v6e
topology: v6e:2x2x1
jax: 0.10.0
libtpu: 0.0.40
codegen_flags: <defaults>
</compile_context>

<pallas_src>
import functools
import math

import jax
import jax.numpy as jnp
import numpy as np
from jax.experimental import pallas as pl
from jax.experimental.pallas import tpu as pltpu

_LN2 = math.log(2.0)


def _round_up(x, m):
    return ((x + m - 1) // m) * m


# --------------------------------------------------------------------------- kernel
def _schnet_msg_kernel(node_ref, edge_ref,
                       w1n_ref, w1e_ref, b1_ref,
                       w2_ref, b2_ref,
                       out_ref, *, node_size):
    """Feature-major fused SchnetMessageFunction tile.

    node_ref : (node_size, TILE)            sender-node states (features on sublanes)
    edge_ref : (edge_size, TILE)            edge states
    w1n_ref  : (2*node_size, node_size)     widened, transposed layer-1 node weight
    w1e_ref  : (2*node_size, edge_size)     widened, transposed layer-1 edge weight
    b1_ref   : (2*node_size, 1)             f32
    w2_ref   : (2*node_size, 2*node_size)   block-diagonal, transposed layer-2
    b2_ref   : (2*node_size, 1)             f32, shifted-softplus -ln2 pre-folded
    out_ref  : (node_size, TILE)
    """
    # Wide hidden h = [h_node ; h_gate] stacked on sublanes; full 128-lane vregs.
    # DEFAULT dot precision -> single-pass MXU; f32 accumulation.
    h = (jnp.dot(w1n_ref[...], node_ref[...], preferred_element_type=jnp.float32)
         + jnp.dot(w1e_ref[...], edge_ref[...], preferred_element_type=jnp.float32)
         + b1_ref[...])
    # shifted_softplus: "-ln2" is folded into b2, so plain softplus here (EUP).
    h = jax.nn.softplus(h)
    # Block-diagonal second layer keeps the branches independent.  Cast back to
    # the matmul dtype (halves MXU passes on the bf16 path; no-op for f32).
    y = (jnp.dot(w2_ref[...], h.astype(w2_ref.dtype),
                 preferred_element_type=jnp.float32)
         + b2_ref[...])
    # Sublane slices at a multiple of 8 -> whole-vreg selection, no VMEM copy.
    nodes = y[:node_size, :]
    gates = y[node_size:, :]
    out_ref[...] = (nodes * gates).astype(out_ref.dtype)


# --------------------------------------------------------------- one-time weight prep
def prepare_message_params(params, dtype=jnp.float32):
    """Hoisted out of the per-call path: call once when params are created/updated.

    `params` holds PyTorch-convention Linear weights stored (in_features,
    out_features): w1n,b1n,w2n,b2n (node branch) and w1e,b1e,w2e,b2e (edge branch).

    Produces kernel-ready tensors: transposed + sublane-widened layer-1 weights,
    a block-diagonal transposed layer-2, biases in f32 with -ln(2) folded into b2.
    Weights are cast to `dtype` (the matmul/HBM-transfer dtype, e.g. bf16).
    """
    f32 = jnp.float32
    w1n, b1n = params["w1n"].astype(f32), params["b1n"].astype(f32)
    w2n, b2n = params["w2n"].astype(f32), params["b2n"].astype(f32)
    w1e, b1e = params["w1e"].astype(f32), params["b1e"].astype(f32)
    w2e, b2e = params["w2e"].astype(f32), params["b2e"].astype(f32)
    node_size = w1n.shape[1]
    edge_size = w1e.shape[0]
    wide = 2 * node_size

    zn = jnp.zeros((node_size, node_size), f32)
    w1n_t = jnp.concatenate([w1n.T, zn], axis=0)                         # (wide, node)
    w1e_t = jnp.concatenate([jnp.zeros((node_size, edge_size), f32),
                             w1e.T], axis=0)                             # (wide, edge)
    w2_t = jnp.concatenate(
        [jnp.concatenate([w2n.T, zn], axis=1),
         jnp.concatenate([zn, w2e.T], axis=1)], axis=0)                  # (wide, wide)
    b1 = jnp.concatenate([b1n, b1e]).reshape(wide, 1)
    b2 = jnp.concatenate([b2n - _LN2 * jnp.sum(w2n, axis=0),
                          b2e - _LN2 * jnp.sum(w2e, axis=0)]).reshape(wide, 1)

    return dict(node_size=node_size, edge_size=edge_size,
                w1n=w1n_t.astype(dtype), w1e=w1e_t.astype(dtype),
                w2=w2_t.astype(dtype), b1=b1, b2=b2)


# ------------------------------------------------------------------------ entry points
def schnet_message_function_fm(node_t, edge_t, prep, *, tile_edges=8192):
    """Feature-major (lane-dense) entry point — the kernel's native layout.

    node_t: (node_size, num_edges), edge_t: (edge_size, num_edges)
    returns (node_size, num_edges).
    """
    node_size, num_edges = node_t.shape
    edge_size = edge_t.shape[0]
    wide = 2 * node_size
    dtype = node_t.dtype
    assert prep["node_size"] == node_size and prep["edge_size"] == edge_size

    # ---- tile selection: edges are on lanes, so tiles are multiples of 128.
    #      Large tiles amortize the ~0.35us per-grid-step overhead; keep >=2
    #      blocks (and an even count when possible) for megacore balance.
    tile = min(max(128, _round_up(tile_edges, 128)),
               max(128, _round_up(pl.cdiv(num_edges, 2), 128)))
    nblk = pl.cdiv(num_edges, tile)
    if nblk > 2 and nblk % 2 == 1:                     # prefer an even step count
        tile = max(128, _round_up(pl.cdiv(num_edges, nblk + 1), 128))
        nblk = pl.cdiv(num_edges, tile)
    grid = (nblk,)
    # No input padding / output slicing: Pallas masks the ragged last block.
    # (num_edges is static at trace time, so no scalar-prefetch arg is needed.)

    act = jnp.dtype(dtype).itemsize
    cost = pl.CostEstimate(
        flops=int(num_edges) * (2 * wide * (node_size + edge_size + wide)
                                + 3 * wide + node_size),
        transcendentals=2 * int(num_edges) * wide,          # exp + log1p per softplus
        bytes_accessed=(act * num_edges * (2 * node_size + edge_size)       # activations
                        + act * wide * (node_size + edge_size + wide)       # weights
                        + 4 * 2 * wide))                                    # biases

    def full(shape):
        return pl.BlockSpec(shape, lambda i: (0, 0))

    return pl.pallas_call(
        functools.partial(_schnet_msg_kernel, node_size=node_size),
        out_shape=jax.ShapeDtypeStruct((node_size, num_edges), dtype),
        grid_spec=pltpu.PrefetchScalarGridSpec(
            num_scalar_prefetch=0,
            grid=grid,
            in_specs=[
                pl.BlockSpec((node_size, tile), lambda i: (0, i)),   # node states
                pl.BlockSpec((edge_size, tile), lambda i: (0, i)),   # edge states
                full((wide, node_size)),                             # W1 node (widened)
                full((wide, edge_size)),                             # W1 edge (widened)
                full((wide, 1)),                                     # b1
                full((wide, wide)),                                  # W2 (block-diag)
                full((wide, 1)),                                     # b2 (ln2 folded)
            ],
            out_specs=pl.BlockSpec((node_size, tile), lambda i: (0, i)),
        ),
        compiler_params=pltpu.CompilerParams(
            dimension_semantics=("parallel",),
            # Explicit budget: v5e scoped default is only 16 MiB; 8192-lane f32
            # tiles (double-buffered) use ~14 MiB in this layout -> 32 MiB is
            # comfortable everywhere and well under v7x's 64 MiB physical VMEM.
            vmem_limit_bytes=32 * 1024 * 1024,
        ),
        cost_estimate=cost,
    )(node_t, edge_t, prep["w1n"], prep["w1e"], prep["b1"], prep["w2"], prep["b2"])


def schnet_message_function(node_state, edge_state, prep, *, tile_edges=8192):
    """Standard (num_edges, features) interface matching the PyTorch module.

    The boundary transposes are pure layout plumbing for the lane-dense kernel;
    callers that can keep activations feature-major should call
    `schnet_message_function_fm` directly and skip them entirely.
    """
    out_t = schnet_message_function_fm(node_state.T, edge_state.T, prep,
                                       tile_edges=tile_edges)
    return out_t.T


# ---------------------------------------------------------------------------- demo
def init_params(key, node_size, edge_size, dtype=jnp.float32):
    """Deterministic PyTorch-Linear-style init. Weights stored (in, out)."""
    ks = jax.random.split(key, 8)

    def lin(kw, kb, fan_in, fan_out):
        bound = 1.0 / math.sqrt(fan_in)
        w = jax.random.uniform(kw, (fan_in, fan_out), dtype, -bound, bound)
        b = jax.random.uniform(kb, (fan_out,), dtype, -bound, bound)
        return w, b

    w1e, b1e = lin(ks[0], ks[1], edge_size, node_size)
    w2e, b2e = lin(ks[2], ks[3], node_size, node_size)
    w1n, b1n = lin(ks[4], ks[5], node_size, node_size)
    w2n, b2n = lin(ks[6], ks[7], node_size, node_size)
    return dict(w1e=w1e, b1e=b1e, w2e=w2e, b2e=b2e,
                w1n=w1n, b1n=b1n, w2n=w2n, b2n=b2n)


def reference_forward(node_state, edge_state, p):
    ssp = lambda x: jax.nn.softplus(x) - _LN2
    gates = ssp(edge_state @ p["w1e"] + p["b1e"]) @ p["w2e"] + p["b2e"]
    nodes = ssp(node_state @ p["w1n"] + p["b1n"]) @ p["w2n"] + p["b2n"]
    return nodes * gates


if __name__ == "__main__":
    node_size, edge_size = 32, 64
    num_edges = 300   # deliberately NOT a multiple of 128: exercises the ragged
                      # last block (no padding / slicing) and a 2-block grid.

    key = jax.random.PRNGKey(0)
    k_node, k_edge, k_param = jax.random.split(key, 3)
    node_state = jax.random.normal(k_node, (num_edges, node_size), jnp.float32)
    edge_state = jax.random.normal(k_edge, (num_edges, edge_size), jnp.float32)
    params = init_params(k_param, node_size, edge_size)
    ref = reference_forward(node_state, edge_state, params)

    # ---- f32 path -----------------------------------------------------------
    prep32 = prepare_message_params(params, jnp.float32)     # hoisted, one-time
    out = jax.block_until_ready(
        schnet_message_function(node_state, edge_state, prep32))
    np.testing.assert_allclose(np.asarray(out), np.asarray(ref),
                               rtol=1e-5, atol=1e-5)

    # ---- bf16-for-HBM path (v5e/v6e lever): bf16 matmul inputs, f32 elementwise
    prep16 = prepare_message_params(params, jnp.bfloat16)
    out16 = jax.block_until_ready(
        schnet_message_function(node_state.astype(jnp.bfloat16),
                                edge_state.astype(jnp.bfloat16), prep16))
    np.testing.assert_allclose(np.asarray(out16.astype(jnp.float32)),
                               np.asarray(ref), rtol=0.08, atol=0.08)

    print("KERNEL_OK")
</pallas_src>

<mosaic_0001>
module attributes {stable_mosaic.version = 11 : i64} {
  func.func @_schnet_msg_kernel(%arg0: i32, %arg1: memref<32x256xf32, #tpu.memory_space<vmem>>, %arg2: memref<64x256xf32, #tpu.memory_space<vmem>>, %arg3: memref<64x32xf32, #tpu.memory_space<vmem>>, %arg4: memref<64x64xf32, #tpu.memory_space<vmem>>, %arg5: memref<64x1xf32, #tpu.memory_space<vmem>>, %arg6: memref<64x64xf32, #tpu.memory_space<vmem>>, %arg7: memref<64x1xf32, #tpu.memory_space<vmem>>, %arg8: memref<32x256xf32, #tpu.memory_space<vmem>>) attributes {dimension_semantics = [#tpu.dimension_semantics<parallel>], iteration_bounds = array<i64: 2>, scalar_prefetch = 0 : i64, scratch_operands = 0 : i64, tpu.core_type = #tpu.core_type<tc>, window_params = [{transform_indices = @transform_0, window_bounds = array<i64: 32, 256>}, {transform_indices = @transform_1, window_bounds = array<i64: 64, 256>}, {pipeline_mode = #tpu.pipeline_mode<synchronous>, transform_indices = @transform_2, window_bounds = array<i64: 64, 32>}, {pipeline_mode = #tpu.pipeline_mode<synchronous>, transform_indices = @transform_3, window_bounds = array<i64: 64, 64>}, {pipeline_mode = #tpu.pipeline_mode<synchronous>, transform_indices = @transform_4, window_bounds = array<i64: 64, 1>}, {pipeline_mode = #tpu.pipeline_mode<synchronous>, transform_indices = @transform_5, window_bounds = array<i64: 64, 64>}, {pipeline_mode = #tpu.pipeline_mode<synchronous>, transform_indices = @transform_6, window_bounds = array<i64: 64, 1>}, {transform_indices = @transform_7, window_bounds = array<i64: 32, 256>}]} {
    %c0 = arith.constant 0 : index
    %c0_0 = arith.constant 0 : index
    %0 = vector.load %arg3[%c0, %c0_0] : memref<64x32xf32, #tpu.memory_space<vmem>>, vector<64x32xf32>
    %c0_1 = arith.constant 0 : index
    %c0_2 = arith.constant 0 : index
    %1 = vector.load %arg1[%c0_1, %c0_2] : memref<32x256xf32, #tpu.memory_space<vmem>>, vector<32x256xf32>
    %cst = arith.constant dense<0.000000e+00> : vector<64x256xf32>
    %2 = tpu.matmul %0, %1, %cst {dimension_numbers = #tpu.dot_dimension_numbers<[1], [0], [0], [1], [0, 0, 1, 1], [], []>} : vector<64x32xf32>, vector<32x256xf32>, vector<64x256xf32> -> vector<64x256xf32>
    %c0_3 = arith.constant 0 : index
    %c0_4 = arith.constant 0 : index
    %3 = vector.load %arg4[%c0_3, %c0_4] : memref<64x64xf32, #tpu.memory_space<vmem>>, vector<64x64xf32>
    %c0_5 = arith.constant 0 : index
    %c0_6 = arith.constant 0 : index
    %4 = vector.load %arg2[%c0_5, %c0_6] : memref<64x256xf32, #tpu.memory_space<vmem>>, vector<64x256xf32>
    %cst_7 = arith.constant dense<0.000000e+00> : vector<64x256xf32>
    %5 = tpu.matmul %3, %4, %cst_7 {dimension_numbers = #tpu.dot_dimension_numbers<[1], [0], [0], [1], [0, 0, 1, 1], [], []>} : vector<64x64xf32>, vector<64x256xf32>, vector<64x256xf32> -> vector<64x256xf32>
    %6 = arith.addf %2, %5 : vector<64x256xf32>
    %c0_8 = arith.constant 0 : index
    %c0_9 = arith.constant 0 : index
    %7 = vector.load %arg5[%c0_8, %c0_9] : memref<64x1xf32, #tpu.memory_space<vmem>>, vector<64x1xf32>
    %8 = vector.broadcast %7 : vector<64x1xf32> to vector<64x256xf32>
    %9 = arith.addf %6, %8 : vector<64x256xf32>
    %cst_10 = arith.constant 0.000000e+00 : f32
    %10 = vector.broadcast %cst_10 : f32 to vector<64x256xf32>
    %11 = arith.maximumf %9, %10 : vector<64x256xf32>
    %12 = vector.broadcast %cst_10 : f32 to vector<64x256xf32>
    %13 = arith.subf %9, %12 : vector<64x256xf32>
    %14 = arith.cmpf one, %13, %13 : vector<64x256xf32>
    %15 = vector.broadcast %cst_10 : f32 to vector<64x256xf32>
    %16 = arith.addf %9, %15 : vector<64x256xf32>
    %17 = math.absf %13 : vector<64x256xf32>
    %cst_11 = arith.constant 0.000000e+00 : f32
    %18 = vector.broadcast %cst_11 : f32 to vector<64x256xf32>
    %19 = arith.subf %18, %17 : vector<64x256xf32>
    %20 = math.exp %19 : vector<64x256xf32>
    %21 = math.log1p %20 : vector<64x256xf32>
    %22 = arith.addf %11, %21 : vector<64x256xf32>
    %23 = arith.select %14, %16, %22 : vector<64x256xi1>, vector<64x256xf32>
    %c0_12 = arith.constant 0 : index
    %c0_13 = arith.constant 0 : index
    %24 = vector.load %arg6[%c0_12, %c0_13] : memref<64x64xf32, #tpu.memory_space<vmem>>, vector<64x64xf32>
    %cst_14 = arith.constant dense<0.000000e+00> : vector<64x256xf32>
    %25 = tpu.matmul %24, %23, %cst_14 {dimension_numbers = #tpu.dot_dimension_numbers<[1], [0], [0], [1], [0, 0, 1, 1], [], []>} : vector<64x64xf32>, vector<64x256xf32>, vector<64x256xf32> -> vector<64x256xf32>
    %c0_15 = arith.constant 0 : index
    %c0_16 = arith.constant 0 : index
    %26 = vector.load %arg7[%c0_15, %c0_16] : memref<64x1xf32, #tpu.memory_space<vmem>>, vector<64x1xf32>
    %27 = vector.broadcast %26 : vector<64x1xf32> to vector<64x256xf32>
    %28 = arith.addf %25, %27 : vector<64x256xf32>
    %29 = vector.extract_strided_slice %28 {offsets = [0, 0], sizes = [32, 256], strides = [1, 1]} : vector<64x256xf32> to vector<32x256xf32>
    %30 = vector.extract_strided_slice %28 {offsets = [32, 0], sizes = [32, 256], strides = [1, 1]} : vector<64x256xf32> to vector<32x256xf32>
    %31 = arith.mulf %29, %30 : vector<32x256xf32>
    %c0_17 = arith.constant 0 : index
    %c0_18 = arith.constant 0 : index
    %32 = vector.load %arg8[%c0_17, %c0_18] : memref<32x256xf32, #tpu.memory_space<vmem>>, vector<32x256xf32>
    tpu.vector_store %arg8[%c0_17, %c0_18], %31 {strides = array<i32>} : memref<32x256xf32, #tpu.memory_space<vmem>>, vector<32x256xf32>,
    return
  }
  func.func @transform_0(%arg0: i32) -> (i32, i32) {
    %c0_i32 = arith.constant 0 : i32
    %c0_i32_0 = arith.constant 0 : i32
    return %c0_i32, %arg0 : i32, i32
  }
  func.func @transform_1(%arg0: i32) -> (i32, i32) {
    %c0_i32 = arith.constant 0 : i32
    %c0_i32_0 = arith.constant 0 : i32
    return %c0_i32, %arg0 : i32, i32
  }
  func.func @transform_2(%arg0: i32) -> (i32, i32) {
    %c0_i32 = arith.constant 0 : i32
    %c0_i32_0 = arith.constant 0 : i32
    %c0_i32_1 = arith.constant 0 : i32
    return %c0_i32, %c0_i32_0 : i32, i32
  }
  func.func @transform_3(%arg0: i32) -> (i32, i32) {
    %c0_i32 = arith.constant 0 : i32
    %c0_i32_0 = arith.constant 0 : i32
    %c0_i32_1 = arith.constant 0 : i32
    return %c0_i32, %c0_i32_0 : i32, i32
  }
  func.func @transform_4(%arg0: i32) -> (i32, i32) {
    %c0_i32 = arith.constant 0 : i32
    %c0_i32_0 = arith.constant 0 : i32
    %c0_i32_1 = arith.constant 0 : i32
    return %c0_i32, %c0_i32_0 : i32, i32
  }
  func.func @transform_5(%arg0: i32) -> (i32, i32) {
    %c0_i32 = arith.constant 0 : i32
    %c0_i32_0 = arith.constant 0 : i32
    %c0_i32_1 = arith.constant 0 : i32
    return %c0_i32, %c0_i32_0 : i32, i32
  }
  func.func @transform_6(%arg0: i32) -> (i32, i32) {
    %c0_i32 = arith.constant 0 : i32
    %c0_i32_0 = arith.constant 0 : i32
    %c0_i32_1 = arith.constant 0 : i32
    return %c0_i32, %c0_i32_0 : i32, i32
  }
  func.func @transform_7(%arg0: i32) -> (i32, i32) {
    %c0_i32 = arith.constant 0 : i32
    %c0_i32_0 = arith.constant 0 : i32
    return %c0_i32, %arg0 : i32, i32
  }
}

</mosaic_0001>

<bundles_post_ra>
// kernel: tpu_custom_call.1
= control target key start
LH: loop header
LB: loop body
LE: loop exit
PB: predicated region body
PF: predicated region fallthrough
CT: control target
= control target key end

     0   :  { %s3662_s0 = inlined_call_operand.hbm [shape: f32[32,300], index: 0, kind: input, shape index: {}]   ;;  %s3663_s1 = inlined_call_operand.vmem [shape: f32[64,300], index: 1, kind: input, shape index: {}]   ;;  %s3664_s2 = inlined_call_operand.vmem [shape: f32[64,32], index: 2, kind: input, shape index: {}]   ;;  %s3665_s3 = inlined_call_operand.hbm [shape: f32[64,64], index: 3, kind: input, shape index: {}]   ;;  %s3666_s4 = inlined_call_operand.vmem [shape: f32[64,1], index: 4, kind: input, shape index: {}]   ;;  %s3667_s5 = inlined_call_operand.hbm [shape: f32[64,64], index: 5, kind: input, shape index: {}]   ;;  %s3668_s6 = inlined_call_operand.vmem [shape: f32[64,1], index: 6, kind: input, shape index: {}]   ;;  %s3669_s7 = inlined_call_operand.hbm [shape: f32[32,300], index: 7, kind: output, shape index: {}]  }
   0x1   :  { %3677 = sst [smem:[#allocation15_spill]] %s3662_s0 }
   0x2   :  { %3678 = sst [smem:[#allocation16_spill]] %s3663_s1 }
   0x3   :  { %3679 = sst [smem:[#allocation17_spill]] %s3665_s3 }
   0x4   :  { %3680 = sst [smem:[#allocation18_spill]] %s3667_s5 }
   0x5   :  { %12 = vsyncpa [#allocation3], 0 }
   0x6   :  { %14 = vsyncpa [#allocation3 + $0x1], 0 }
   0x7   :  { %15 = vsyncpa [#allocation7], 0 }
   0x8   :  { %16 = vsyncpa [#allocation4], 0 }
   0x9   :  { %18 = vsyncpa [#allocation4 + $0x1], 0  ;;  %s2620_s24 = smov 0   ;;  %s2622_s25 = smov 0  }
   0xa   :  { %s2624_s26 = smov 0   ;;  %s2626_s27 = smov 0  }
   0xb LB: > { %s2641_s28 = sadd.s32 4294967295, %s2500_s27   ;;  %s1925_s29 = sadd.s32 4294967294, %s2500_s27   ;;  %s2500_s27 = sphi %s2626_s27, %s3736_s27   ;;  %s2496_s26 = sphi %s2624_s26, %s3740_s26   ;;  %s2492_s25 = sphi %s2622_s25, %s3739_s25   ;;  %s2488_s24 = sphi %s2620_s24, %s3738_s24  }
   0xc   : > { %s2645_s30 = sadd.s32 1, %s2500_s27   ;;  %s31_s8 = sadd.s32 1, %s2496_s26 }
   0xd   : > { %3681 = sst [smem:[#allocation13_spill]] %s2645_s30  ;;  %s28_s9 = ssub.s32 %s2500_s27, %s2645_s30 }
   0xe   : > { %p38_p0 = scmp.ne.s32.totalorder %s2496_s26, %s2492_s25  ;;  %p29_p1 = scmp.eq.s32.totalorder %s28_s9, 0 }
   0xf   : > { %p39_p2 = scmp.eq.s32.totalorder %s2500_s27, 0  ;;  %p44_p3 = scmp.ne.s32.totalorder %s2492_s25, %s2488_s24 }
  0x10   : > { %p3670_p4 = scmp.eq.s32.totalorder %s2641_s28, 0  ;;  %p199_p7 = scmp.eq.s32.totalorder %s2641_s28, 1 }
  0x11   : > { %s2657_s10 = scalar_select %p29_p1, %s2496_s26, %s31_s8  }
  0x12   : > { %p2659_p5 = por %p39_p2, %p38_p0  ;;  %p2665_p6 = por %p3670_p4, %p44_p3 }
  0x13   : > { %3682 = sst [smem:[#allocation14_spill]] %s2657_s10  ;;  %p205_p8 = scmp.eq.s32.totalorder %s1925_s29, 1 }
  0x14   : > { %s3684_s12 = scalar_select %p2665_p6, 1, 0 }
  0x15   : > { %p1926_p9 = scmp.ge.s32.totalorder %s2500_s27, 1  ;;  %p212_p10 = scmp.lt.s32.totalorder %s2500_s27, 3 }
  0x16   : > { %p2672_p11 = por %p199_p7, %p38_p0  ;;  %p2676_p12 = por %p205_p8, %p44_p3 }
  0x17   : > { %p2680_p13 = pnand %p1926_p9, %p212_p10  ;;  %s2566_s16 = smov [#allocation6]  }
  0x18   : > { %s3685_s13 = scalar_select %p2672_p11, 1, 0 }
  0x19   : > { %s3686_s14 = scalar_select %p2676_p12, 1, 0 }
  0x1a   : > { %p2036_p1 = pneg %p2680_p13  ;;  %s227_s17 = sshll.u32 %s2566_s16, 4  ;;  %s228_s17 = int_to_ptr.vmem [resolvable:$true] %s227_s17 }
  0x1b   : > { %s2567_s19 = smov [#allocation8]   ;;  %s2301_s21 = scalar_lea.vmem %s228_s17, 1024 }
  0x1c   : > { %p2688_p2 = pnand %p2036_p1, %p3670_p4  ;;  %s243_s20 = sshll.u32 %s2567_s19, 4  ;;  %s244_s20 = int_to_ptr.vmem [resolvable:$true] %s243_s20 }
  0x1d   : > { %p2302_p3 = scmp.ne.s32.totalorder %s228_s17, %s2301_s21  ;;  %p2309_p9 = scmp.lt.s32.totalorder %s228_s17, %s228_s17 }
  0x1e   : > { %p2292_p0 = pneg %p2688_p2  ;;  %p2310_p10 = scmp.lt.s32.totalorder %s2301_s21, %s2301_s21 }
  0x20   : > { %p2304_p7 = pnand %p2302_p3, %p2292_p0  ;;  %p2311_p12 = por %p2310_p10, %p2309_p9 }
  0x22   : > { %p2305_p8 = pneg %p2304_p7 }
  0x24   : > { %p2312_p1 = pnand %p2311_p12, %p2305_p8 }
  0x26   : > { %2315 = shalt.err (!%p2312_p1)
}
  0x27   : > { %s2568_s22 = smov 128   ;;  %s2569_s23 = smov 8  }
  0x28   : > { %s3689_s3 = sld [smem:[#allocation17_spill]]  ;;  %s2327_s9 = scalar_lea.vmem %s244_s20, 1024 }
  0x29   : > { %p2328_p4 = scmp.ne.s32.totalorder %s244_s20, %s2327_s9  ;;  %p2335_p11 = scmp.lt.s32.totalorder %s244_s20, %s244_s20 }
  0x2a   : > { %p2336_p6 = scmp.lt.s32.totalorder %s2327_s9, %s2327_s9 }
  0x2b   : > { %p2330_p3 = pnand %p2328_p4, %p2292_p0 }
  0x2c   : > { %p2337_p9 = por %p2336_p6, %p2335_p11 }
  0x2d   : > { %p2331_p7 = pneg %p2330_p3 }
  0x2e   : > { %2039 = dma.hbm_to_vmem [thread:$0]  (!%p2688_p2), %s3689_s3, 1024, %s228_s17, [#allocation7], %s2568_s22, %s2568_s22, %s2569_s23  }
  0x2f   : > { %p2338_p12 = pnand %p2337_p9, %p2331_p7 }
  0x31   : > { %2341 = shalt.err (!%p2338_p12)
}
  0x32   : > { %s3690_s5 = sld [smem:[#allocation18_spill]]  ;;  %p3674_p8 = scmp.ge.s32.totalorder %s2500_s27, 2 }
  0x34   : > { %256 = sbr.rel (%p3674_p8) target bundleno = 218 (0xda), region = 36 }
  0x38   : > { %2042 = dma.hbm_to_vmem [thread:$0]  (!%p2688_p2), %s3690_s5, 1024, %s244_s20, [#allocation7], %s2568_s22, %s2568_s22, %s2569_s23  }
  0x39   : > { %259 = sbr.rel (!%p2659_p5) target bundleno = 95 (0x5f), region = 40  ;;  %s260_s17 = sand.u32 (%p2659_p5), 1, %s2496_s26  }
  0x3a   : > { %s1931_s21 = sshll.u32 (%p2659_p5), %s2500_s27, 1  ;;  %s1930_s29 = sshll.u32 (%p2659_p5), %s260_s17, 6 }
  0x3b   : > { %s266_s8 = ssub.s32 (%p2659_p5), 3, %s1931_s21  ;;  %s2723_s22 = scalar_lea.sflag (%p2659_p5), [#allocation3], %s260_s17 }
  0x3c   : > { %p267_p4 = scmp.lt.s32.totalorder (%p2659_p5), %s266_s8, 2  ;;  %s264_s23 = scalar_lea.vmem (%p2659_p5), [#allocation2], %s1930_s29 }
  0x3e   : > { %s3742_s8 = smov (!%p267_p4, %s266_s8), 2 }
  0x3f   : > { %s2720_s18 = sshll.u32 %s3742_s8, 9 }
  0x40   : > { %s271_s20 = ssub.s32 1024, %s2720_s18 }
  0x41   : > { %272 = vsyncadd %s2723_s22, %s271_s20  ;;  %p1933_p6 = scmp.ne.s32.totalorder %s2720_s18, 0  ;;  %s2007_s9 = sshll.u32 %s2500_s27, 8 }
  0x42   : > { %s3691_s0 = sld [smem:[#allocation15_spill]]  ;;  %s1935_s17 = sshll.u32 %s3742_s8, 3 }
  0x43   : > { %s278_s3 = sshll.u32 %s264_s23, 4  ;;  %s2734_s3 = int_to_ptr.vmem [resolvable:$true] %s278_s3 }
  0x48   : > { %s2731_s21 = scalar_lea.hbm %s3691_s0, %s2007_s9  ;;  %s2346_s10 = scalar_lea.hbm %s3691_s0, 1536 }
  0x49   : > { %s2342_s29 = scalar_lea.hbm %s2731_s21, %s2720_s18  ;;  %p2347_p10 = scmp.lt.s32.totalorder %s2731_s21, %s3691_s0 }
  0x4a   : > { %p2343_p11 = scmp.ne.s32.totalorder %s2731_s21, %s2342_s29  ;;  %p2348_p1 = scmp.lt.s32.totalorder %s2346_s10, %s2342_s29 }
  0x4c   : > { %p2344_p2 = pnand %p2343_p11, %p1933_p6  ;;  %p2349_p3 = por %p2348_p1, %p2347_p10 }
  0x4e   : > { %p2345_p0 = pneg %p2344_p2 }
  0x50   : > { %p2350_p7 = pnand %p2349_p3, %p2345_p0 }
  0x52   : > { %2353 = shalt.err (!%p2350_p7)
}
  0x53   : > { %s2354_s23 = scalar_lea.vmem %s2734_s3, %s2720_s18  ;;  %s2570_s5 = smov [#allocation2]  }
  0x54   : > { %p2355_p9 = scmp.ne.s32.totalorder %s2734_s3, %s2354_s23  ;;  %s2358_s9 = sshll.u32 %s2570_s5, 4  ;;  %s2359_s9 = int_to_ptr.vmem [resolvable:$false] %s2358_s9 }
  0x55   : > { %s2360_s19 = scalar_lea.vmem %s2359_s9, 2048  ;;  %p2361_p11 = scmp.lt.s32.totalorder %s2734_s3, %s2359_s9 }
  0x56   : > { %p2356_p12 = pnand %p2355_p9, %p1933_p6  ;;  %p2362_p2 = scmp.lt.s32.totalorder %s2360_s19, %s2354_s23 }
  0x58   : > { %p2357_p4 = pneg %p2356_p12  ;;  %p2363_p8 = por %p2362_p2, %p2361_p11 }
  0x5a   : > { %p2364_p10 = pnand %p2363_p8, %p2357_p4 }
  0x5c   : > { %2367 = shalt.err (!%p2364_p10)
}
  0x5d   : > { %s2571_s30 = smov 384   ;;  %s2572_s10 = smov 256  }
  0x5e   : > { %284 = dma.hbm_to_vmem [thread:$0]  (%p1933_p6), %s2731_s21, %s2720_s18, %s2734_s3, %s2723_s22, %s2571_s30, %s2572_s10, %s1935_s17  }
  0x5f PF: > { %287 = sbr.rel (!%p2659_p5) target bundleno = 218 (0xda), region = 44  ;;  %s289_s29 = sand.u32 (%p2659_p5), 1, %s2496_s26  }
  0x60   : > { %s1939_s20 = sshll.u32 (%p2659_p5), %s2500_s27, 1  ;;  %s1938_s16 = sshll.u32 (%p2659_p5), %s289_s29, 7 }
  0x61   : > { %s293_s23 = ssub.s32 (%p2659_p5), 3, %s1939_s20  ;;  %s2010_s5 = sshll.u32 (%p2659_p5), %s2500_s27, 4 }
  0x62   : > { %p294_p8 = scmp.lt.s32.totalorder (%p2659_p5), %s293_s23, 2  ;;  %s3692_s1 = sld [smem:[#allocation16_spill]] (%p2659_p5) }
  0x63   : > { %s2774_s11 = scalar_lea.vmem (%p2659_p5), [#allocation5], %s1938_s16  }
  0x64   : > { %s3744_s23 = smov (!%p294_p8, %s293_s23), 2 }
  0x65   : > { %s1940_s3 = sshll.u32 %s3744_s23, 10  ;;  %s2772_s8 = sshll.u32 %s3744_s23, 3 }
  0x66   : > { %p1944_p5 = scmp.eq.s32.totalorder %s1940_s3, 0 }
  0x67   : > { %p304_p6 = scmp.lt.u32.totalorder (!%p1944_p5), %s2772_s8, 8 }
  0x68   : > { %s2770_s0 = scalar_lea.vmem %s3692_s1, %s2010_s5   ;;  %303 = sbr.rel (%p1944_p5) target bundleno = 218 (0xda), region = 48 }
  0x6d   : > { %307 = sbr.rel (%p304_p6) target bundleno = 203 (0xcb), region = 52  ;;  %s2778_s18 = sand.u32 (!%p304_p6), 7, %s2772_s8  }
  0x6e   : > { %p338_p0 = scmp.eq.s32.totalorder (!%p304_p6), %s2778_s18, 0  ;;  %p1945_p1 = scmp.ne.s32.totalorder (!%p304_p6), %s2778_s18, 0 }
  0x72   : > { %341 = sbr.rel (%p1945_p1) target bundleno = 153 (0x99), region = 67  ;;  %s342_s22 = sshrl.u32 (!%p1945_p1), %s2772_s8, 3 }
  0x73   : > { %s2785_s21 = sshrl.u32 (!%p1945_p1), %s342_s22, 3 }
  0x74   : > { %p1946_p3 = scmp.le.s32.totalorder (!%p1945_p1), %s2785_s21, 0 }
  0x77   : > { %1826 = sbr.rel (%p1946_p3) target bundleno = 137 (0x89), region = 187  ;;  %s3693_s17 = smov (!%p1946_p3), %s2774_s11 }
  0x78   : > { %s3694_s30 = smov (!%p1946_p3), %s2770_s0  ;;  %s2794_s10 = smov (!%p1946_p3), 0  }
  0x79   : > { %s2796_s29 = smov (!%p1946_p3), 0  }
  0x7c LB: >> { %v447_v0 = vld [vmem:[%s2508_s30 + $0xa8] sm:$0xff]  ;;  %v449_v1 = vld [vmem:[%s2508_s30 + $0xb0] sm:$0xff]  ;;  %v361_v2 = vld [vmem:[%s2508_s30 + $0x18] sm:$0xff]  ;;  %s483_s20 = sadd.s32 1, %s2512_s10  ;;  %s349_s29 = sadd.s32 1, %s2516_s29   ;;  %s2516_s29 = sphi %s2796_s29, %s349_s29   ;;  %s2512_s10 = sphi %s2794_s10, %s3695_s10   ;;  %s2508_s30 = sphi %s3694_s30, %s488_s30   ;;  %s2504_s17 = sphi %s3693_s17, %s489_s17  }
  0x7d   : >> { %v377_v3 = vld [vmem:[%s2508_s30 + $0x30] sm:$0xff]  ;;  %v393_v4 = vld [vmem:[%s2508_s30 + $0x48] sm:$0xff]  ;;  %v409_v5 = vld [vmem:[%s2508_s30 + $0x60] sm:$0xff]  ;;  %372 = vst [vmem:[%s2504_s17 + $0x10] sm:$0xff] %v361_v2  ;;  %p484_p7 = scmp.ge.s32.totalorder %s483_s20, %s2785_s21  ;;  %p348_p9 = scmp.ge.s32.totalorder %s349_s29, %s2785_s21 }
  0x7e   : >> { %468 = vst [vmem:[%s2504_s17 + $0x70] sm:$0xff] %v447_v0  ;;  %470 = vst [vmem:[%s2504_s17 + $0x78] sm:$0xff] %v449_v1  ;;  %v425_v6 = vld [vmem:[%s2508_s30 + $0x78] sm:$0xff]  ;;  %v441_v7 = vld [vmem:[%s2508_s30 + $0x90] sm:$0xff] }
  0x7f   : >> { %v461_v8 = vld [vmem:[%s2508_s30 + $0xb8] sm:$0xff]  ;;  %388 = vst [vmem:[%s2504_s17 + $0x20] sm:$0xff] %v377_v3  ;;  %404 = vst [vmem:[%s2504_s17 + $0x30] sm:$0xff] %v393_v4  ;;  %v463_v9 = vld [vmem:[%s2508_s30 + $0xc0] sm:$0xff]  ;;  %s3746_s20 = smov (%p484_p7, %s483_s20), 0 }
  0x80   : >> { %420 = vst [vmem:[%s2504_s17 + $0x40] sm:$0xff] %v409_v5  ;;  %v465_v10 = vld [vmem:[%s2508_s30 + $0xc8] sm:$0xff]  ;;  %v355_v11 = vld [vmem:[%s2508_s30] sm:$0xff]  ;;  %436 = vst [vmem:[%s2504_s17 + $0x50] sm:$0xff] %v425_v6  ;;  %s1947_s16 = sshll.u32 %s3746_s20, 6  ;;  %s3695_s10 = smov %s3746_s20 }
  0x81   : >> { %452 = vst [vmem:[%s2504_s17 + $0x60] sm:$0xff] %v441_v7  ;;  %472 = vst [vmem:[%s2504_s17 + $0x80] sm:$0xff] %v461_v8  ;;  %v357_v12 = vld [vmem:[%s2508_s30 + $0x8] sm:$0xff]  ;;  %v373_v13 = vld [vmem:[%s2508_s30 + $0x20] sm:$0xff] }
  0x82   : >> { %356 = vst [vmem:[%s2504_s17] sm:$0xff] %v355_v11  ;;  %v389_v14 = vld [vmem:[%s2508_s30 + $0x38] sm:$0xff]  ;;  %474 = vst [vmem:[%s2504_s17 + $0x88] sm:$0xff] %v463_v9  ;;  %v405_v15 = vld [vmem:[%s2508_s30 + $0x50] sm:$0xff] }
  0x83   : >> { %476 = vst [vmem:[%s2504_s17 + $0x90] sm:$0xff] %v465_v10  ;;  %358 = vst [vmem:[%s2504_s17 + $0x8] sm:$0xff] %v357_v12  ;;  %v421_v16 = vld [vmem:[%s2508_s30 + $0x68] sm:$0xff]  ;;  %v437_v17 = vld [vmem:[%s2508_s30 + $0x80] sm:$0xff] }
  0x84   : >> { %374 = vst [vmem:[%s2504_s17 + $0x18] sm:$0xff] %v373_v13  ;;  %390 = vst [vmem:[%s2504_s17 + $0x28] sm:$0xff] %v389_v14  ;;  %v453_v18 = vld [vmem:[%s2508_s30 + $0x98] sm:$0xff]  ;;  %v477_v19 = vld [vmem:[%s2508_s30 + $0xd0] sm:$0xff]  ;;  %351 = sbr.rel (!%p348_p9) target bundleno = 124 (0x7c), region = 193 }
  0x85   : >> { %406 = vst [vmem:[%s2504_s17 + $0x38] sm:$0xff] %v405_v15  ;;  %422 = vst [vmem:[%s2504_s17 + $0x48] sm:$0xff] %v421_v16  ;;  %v479_v20 = vld [vmem:[%s2508_s30 + $0xd8] sm:$0xff]  ;;  %v481_v21 = vld [vmem:[%s2508_s30 + $0xe0] sm:$0xff]  ;;  %s488_s30 = scalar_lea.vmem %s2770_s0, %s1947_s16  }
  0x86   : >> { %438 = vst [vmem:[%s2504_s17 + $0x58] sm:$0xff] %v437_v17  ;;  %454 = vst [vmem:[%s2504_s17 + $0x68] sm:$0xff] %v453_v18 }
  0x87   : >> { %478 = vst [vmem:[%s2504_s17 + $0x98] sm:$0xff] %v477_v19  ;;  %480 = vst [vmem:[%s2504_s17 + $0xa0] sm:$0xff] %v479_v20 }
  0x88   : >> { %482 = vst [vmem:[%s2504_s17 + $0xa8] sm:$0xff] %v481_v21  ;;  %s489_s17 = scalar_lea.vmem %s2774_s11, %s1947_s16 [#allocation5]  }
  0x89 PF: > { %s2870_s23 = sand.u32 7, %s342_s22   ;;  %s2011_s5 = sshll.u32 %s2785_s21, 10 }
  0x8a   : > { %s494_s9 = sshra.s32 %s2011_s5, 4  ;;  %p1952_p12 = scmp.le.s32.totalorder %s2870_s23, 0 }
  0x8b   : > { %s2874_s19 = scalar_lea.vmem %s2770_s0, %s494_s9   ;;  %s2877_s3 = scalar_lea.vmem %s2774_s11, %s494_s9 [#allocation5]  }
  0x8c   : > { %1840 = sbr.rel (%p1952_p12) target bundleno = 153 (0x99), region = 198  ;;  %s3696_s17 = smov (!%p1952_p12), %s2877_s3 }
  0x8d   : > { %s3697_s30 = smov (!%p1952_p12), %s2874_s19  ;;  %s2886_s10 = smov (!%p1952_p12), 0  }
  0x8e   : > { %s2888_s29 = smov (!%p1952_p12), 0  }
  0x91 LB: >> { %v510_v22 = vld [vmem:[%s2524_s30] sm:$0xff]  ;;  %v512_v23 = vld [vmem:[%s2524_s30 + $0x18] sm:$0xff]  ;;  %v514_v24 = vld [vmem:[%s2524_s30 + $0x30] sm:$0xff]  ;;  %s526_s22 = sadd.s32 1, %s2528_s10  ;;  %s504_s29 = sadd.s32 1, %s2532_s29   ;;  %s2532_s29 = sphi %s2888_s29, %s504_s29   ;;  %s2528_s10 = sphi %s2886_s10, %s3698_s10   ;;  %s2524_s30 = sphi %s3697_s30, %s531_s30   ;;  %s2520_s17 = sphi %s3696_s17, %s532_s17  }
  0x92   : >> { %511 = vst [vmem:[%s2520_s17] sm:$0xff] %v510_v22  ;;  %513 = vst [vmem:[%s2520_s17 + $0x10] sm:$0xff] %v512_v23  ;;  %v516_v25 = vld [vmem:[%s2524_s30 + $0x48] sm:$0xff]  ;;  %v518_v26 = vld [vmem:[%s2524_s30 + $0x60] sm:$0xff]  ;;  %p527_p4 = scmp.ge.s32.totalorder %s526_s22, %s2870_s23  ;;  %p503_p11 = scmp.ge.s32.totalorder %s504_s29, %s2870_s23 }
  0x93   : >> { %515 = vst [vmem:[%s2520_s17 + $0x20] sm:$0xff] %v514_v24  ;;  %v520_v27 = vld [vmem:[%s2524_s30 + $0x78] sm:$0xff]  ;;  %517 = vst [vmem:[%s2520_s17 + $0x30] sm:$0xff] %v516_v25  ;;  %v522_v28 = vld [vmem:[%s2524_s30 + $0x90] sm:$0xff] }
  0x94   : >> { %519 = vst [vmem:[%s2520_s17 + $0x40] sm:$0xff] %v518_v26  ;;  %521 = vst [vmem:[%s2520_s17 + $0x50] sm:$0xff] %v520_v27  ;;  %v524_v29 = vld [vmem:[%s2524_s30 + $0xa8] sm:$0xff]  ;;  %s3748_s22 = smov (%p527_p4, %s526_s22), 0  ;;  %506 = sbr.rel (!%p503_p11) target bundleno = 145 (0x91), region = 204 }
  0x95   : >> { %523 = vst [vmem:[%s2520_s17 + $0x60] sm:$0xff] %v522_v28  ;;  %525 = vst [vmem:[%s2520_s17 + $0x70] sm:$0xff] %v524_v29  ;;  %s1953_s21 = sshll.u32 %s3748_s22, 3  ;;  %s3698_s10 = smov %s3748_s22 }
  0x96   : >> { %s531_s30 = scalar_lea.vmem %s2874_s19, %s1953_s21   ;;  %s532_s17 = scalar_lea.vmem %s2877_s3, %s1953_s21 [#allocation5]  }
  0x99 PF: > { %535 = sbr.rel (%p338_p0) target bundleno = 203 (0xcb), region = 85  ;;  %s537_s20 = ssub.s32 (!%p338_p0), %s2772_s8, %s2778_s18 }
  0x9a   : > { %s541_s16 = sshrl.u32 (!%p338_p0), %s2772_s8, 3  ;;  %s2912_s5 = scalar_lea.vmem (!%p338_p0), %s2770_s0, %s537_s20 }
  0x9b   : > { %s2915_s9 = scalar_lea.vmem (!%p338_p0), %s2774_s11, %s537_s20 [#allocation5]  ;;  %s2919_s29 = sshrl.u32 (!%p338_p0), %s541_s16, 3 }
  0x9c   : > { %p1955_p2 = scmp.le.s32.totalorder (!%p338_p0), %s2919_s29, 0 }
  0x9e   : > { %1854 = sbr.rel (%p1955_p2) target bundleno = 176 (0xb0), region = 209  ;;  %s3699_s23 = smov (!%p1955_p2), %s2774_s11 }
  0x9f   : > { %s3700_s19 = smov (!%p1955_p2), %s2770_s0  ;;  %s2928_s3 = smov (!%p1955_p2), 0  }
  0xa0   : > { %s2930_s17 = smov (!%p1955_p2), 0  }
  0xa3 LB: >> { %v646_v30 = vld [vmem:[%s2540_s19 + $0xa8] sm:$0xff]  ;;  %v648_v31 = vld [vmem:[%s2540_s19 + $0xb0] sm:$0xff]  ;;  %v560_v32 = vld [vmem:[%s2540_s19 + $0x18] sm:$0xff]  ;;  %s682_s30 = sadd.s32 1, %s2544_s3  ;;  %s548_s17 = sadd.s32 1, %s2548_s17   ;;  %s2548_s17 = sphi %s2930_s17, %s548_s17   ;;  %s2544_s3 = sphi %s2928_s3, %s3701_s3   ;;  %s2540_s19 = sphi %s3700_s19, %s687_s19   ;;  %s2536_s23 = sphi %s3699_s23, %s688_s23  }
  0xa4   : >> { %v576_v33 = vld [vmem:[%s2540_s19 + $0x30] sm:$0xff]  ;;  %v592_v34 = vld [vmem:[%s2540_s19 + $0x48] sm:$0xff]  ;;  %v608_v35 = vld [vmem:[%s2540_s19 + $0x60] sm:$0xff]  ;;  %571 = vst [vmem:[%s2536_s23 + $0x10] sm:$0xff] %v560_v32  ;;  %p683_p10 = scmp.ge.s32.totalorder %s682_s30, %s2919_s29  ;;  %p547_p8 = scmp.ge.s32.totalorder %s548_s17, %s2919_s29 }
  0xa5   : >> { %667 = vst [vmem:[%s2536_s23 + $0x70] sm:$0xff] %v646_v30  ;;  %669 = vst [vmem:[%s2536_s23 + $0x78] sm:$0xff] %v648_v31  ;;  %v624_v36 = vld [vmem:[%s2540_s19 + $0x78] sm:$0xff]  ;;  %v640_v37 = vld [vmem:[%s2540_s19 + $0x90] sm:$0xff] }
  0xa6   : >> { %v660_v38 = vld [vmem:[%s2540_s19 + $0xb8] sm:$0xff]  ;;  %587 = vst [vmem:[%s2536_s23 + $0x20] sm:$0xff] %v576_v33  ;;  %603 = vst [vmem:[%s2536_s23 + $0x30] sm:$0xff] %v592_v34  ;;  %v662_v39 = vld [vmem:[%s2540_s19 + $0xc0] sm:$0xff]  ;;  %s3750_s30 = smov (%p683_p10, %s682_s30), 0 }
  0xa7   : >> { %619 = vst [vmem:[%s2536_s23 + $0x40] sm:$0xff] %v608_v35  ;;  %v664_v40 = vld [vmem:[%s2540_s19 + $0xc8] sm:$0xff]  ;;  %v554_v41 = vld [vmem:[%s2540_s19] sm:$0xff]  ;;  %635 = vst [vmem:[%s2536_s23 + $0x50] sm:$0xff] %v624_v36  ;;  %s1956_s10 = sshll.u32 %s3750_s30, 6  ;;  %s3701_s3 = smov %s3750_s30 }
  0xa8   : >> { %651 = vst [vmem:[%s2536_s23 + $0x60] sm:$0xff] %v640_v37  ;;  %671 = vst [vmem:[%s2536_s23 + $0x80] sm:$0xff] %v660_v38  ;;  %v556_v42 = vld [vmem:[%s2540_s19 + $0x8] sm:$0xff]  ;;  %v572_v43 = vld [vmem:[%s2540_s19 + $0x20] sm:$0xff] }
  0xa9   : >> { %555 = vst [vmem:[%s2536_s23] sm:$0xff] %v554_v41  ;;  %v588_v44 = vld [vmem:[%s2540_s19 + $0x38] sm:$0xff]  ;;  %673 = vst [vmem:[%s2536_s23 + $0x88] sm:$0xff] %v662_v39  ;;  %v604_v45 = vld [vmem:[%s2540_s19 + $0x50] sm:$0xff] }
  0xaa   : >> { %675 = vst [vmem:[%s2536_s23 + $0x90] sm:$0xff] %v664_v40  ;;  %557 = vst [vmem:[%s2536_s23 + $0x8] sm:$0xff] %v556_v42  ;;  %v620_v46 = vld [vmem:[%s2540_s19 + $0x68] sm:$0xff]  ;;  %v636_v47 = vld [vmem:[%s2540_s19 + $0x80] sm:$0xff] }
  0xab   : >> { %573 = vst [vmem:[%s2536_s23 + $0x18] sm:$0xff] %v572_v43  ;;  %589 = vst [vmem:[%s2536_s23 + $0x28] sm:$0xff] %v588_v44  ;;  %v652_v48 = vld [vmem:[%s2540_s19 + $0x98] sm:$0xff]  ;;  %v676_v49 = vld [vmem:[%s2540_s19 + $0xd0] sm:$0xff]  ;;  %550 = sbr.rel (!%p547_p8) target bundleno = 163 (0xa3), region = 215 }
  0xac   : >> { %605 = vst [vmem:[%s2536_s23 + $0x38] sm:$0xff] %v604_v45  ;;  %621 = vst [vmem:[%s2536_s23 + $0x48] sm:$0xff] %v620_v46  ;;  %v678_v50 = vld [vmem:[%s2540_s19 + $0xd8] sm:$0xff]  ;;  %v680_v51 = vld [vmem:[%s2540_s19 + $0xe0] sm:$0xff]  ;;  %s687_s19 = scalar_lea.vmem %s2770_s0, %s1956_s10  }
  0xad   : >> { %637 = vst [vmem:[%s2536_s23 + $0x58] sm:$0xff] %v636_v47  ;;  %653 = vst [vmem:[%s2536_s23 + $0x68] sm:$0xff] %v652_v48 }
  0xae   : >> { %677 = vst [vmem:[%s2536_s23 + $0x98] sm:$0xff] %v676_v49  ;;  %679 = vst [vmem:[%s2536_s23 + $0xa0] sm:$0xff] %v678_v50 }
  0xaf   : >> { %681 = vst [vmem:[%s2536_s23 + $0xa8] sm:$0xff] %v680_v51  ;;  %s688_s23 = scalar_lea.vmem %s2774_s11, %s1956_s10 [#allocation5]  }
  0xb0 PF: > { %s3004_s22 = sand.u32 7, %s541_s16   ;;  %s2013_s21 = sshll.u32 %s2919_s29, 10 }
  0xb1   : > { %s693_s20 = sshra.s32 %s2013_s21, 4  ;;  %p1961_p5 = scmp.le.s32.totalorder %s3004_s22, 0 }
  0xb2   : > { %s3008_s10 = scalar_lea.vmem %s2770_s0, %s693_s20   ;;  %s3011_s1 = scalar_lea.vmem %s2774_s11, %s693_s20 [#allocation5]  }
  0xb3   : > { %1868 = sbr.rel (%p1961_p5) target bundleno = 192 (0xc0), region = 220  ;;  %s3702_s23 = smov (!%p1961_p5), %s3011_s1 }
  0xb4   : > { %s3703_s19 = smov (!%p1961_p5), %s3008_s10  ;;  %s3020_s3 = smov (!%p1961_p5), 0  }
  0xb5   : > { %s3022_s17 = smov (!%p1961_p5), 0  }
  0xb8 LB: >> { %v709_v52 = vld [vmem:[%s2556_s19] sm:$0xff]  ;;  %v711_v53 = vld [vmem:[%s2556_s19 + $0x18] sm:$0xff]  ;;  %v713_v54 = vld [vmem:[%s2556_s19 + $0x30] sm:$0xff]  ;;  %s725_s16 = sadd.s32 1, %s2560_s3  ;;  %s703_s17 = sadd.s32 1, %s2564_s17   ;;  %s2564_s17 = sphi %s3022_s17, %s703_s17   ;;  %s2560_s3 = sphi %s3020_s3, %s3704_s3   ;;  %s2556_s19 = sphi %s3703_s19, %s730_s19   ;;  %s2552_s23 = sphi %s3702_s23, %s731_s23  }
  0xb9   : >> { %710 = vst [vmem:[%s2552_s23] sm:$0xff] %v709_v52  ;;  %712 = vst [vmem:[%s2552_s23 + $0x10] sm:$0xff] %v711_v53  ;;  %v715_v55 = vld [vmem:[%s2556_s19 + $0x48] sm:$0xff]  ;;  %v717_v56 = vld [vmem:[%s2556_s19 + $0x60] sm:$0xff]  ;;  %p726_p6 = scmp.ge.s32.totalorder %s725_s16, %s3004_s22  ;;  %p702_p0 = scmp.ge.s32.totalorder %s703_s17, %s3004_s22 }
  0xba   : >> { %714 = vst [vmem:[%s2552_s23 + $0x20] sm:$0xff] %v713_v54  ;;  %v719_v57 = vld [vmem:[%s2556_s19 + $0x78] sm:$0xff]  ;;  %716 = vst [vmem:[%s2552_s23 + $0x30] sm:$0xff] %v715_v55  ;;  %v721_v58 = vld [vmem:[%s2556_s19 + $0x90] sm:$0xff] }
  0xbb   : >> { %718 = vst [vmem:[%s2552_s23 + $0x40] sm:$0xff] %v717_v56  ;;  %720 = vst [vmem:[%s2552_s23 + $0x50] sm:$0xff] %v719_v57  ;;  %v723_v59 = vld [vmem:[%s2556_s19 + $0xa8] sm:$0xff]  ;;  %s3752_s16 = smov (%p726_p6, %s725_s16), 0  ;;  %705 = sbr.rel (!%p702_p0) target bundleno = 184 (0xb8), region = 226 }
  0xbc   : >> { %722 = vst [vmem:[%s2552_s23 + $0x60] sm:$0xff] %v721_v58  ;;  %724 = vst [vmem:[%s2552_s23 + $0x70] sm:$0xff] %v723_v59  ;;  %s1962_s29 = sshll.u32 %s3752_s16, 3  ;;  %s3704_s3 = smov %s3752_s16 }
  0xbd   : >> { %s730_s19 = scalar_lea.vmem %s3008_s10, %s1962_s29   ;;  %s731_s23 = scalar_lea.vmem %s3011_s1, %s1962_s29 [#allocation5]  }
  0xc0 PF: > { %s2573_s30 = smov 1  }
  0xc1   : > { %s732_s21 = sshll.u32 %s2573_s30, %s2778_s18 }
  0xc2   : > { %s1964_s20 = sadd.s32 4294967295, %s732_s21 }
  0xc3   : > { %v742_v60 = vld [vmem:[%s2912_s5] sm:%s1964_s20]  ;;  %v744_v61 = vld [vmem:[%s2912_s5 + $0x18] sm:%s1964_s20] }
  0xc4   : > { %743 = vst [vmem:[%s2915_s9] sm:%s1964_s20] %v742_v60  ;;  %745 = vst [vmem:[%s2915_s9 + $0x10] sm:%s1964_s20] %v744_v61 }
  0xc5   : > { %v746_v62 = vld [vmem:[%s2912_s5 + $0x30] sm:%s1964_s20]  ;;  %v748_v63 = vld [vmem:[%s2912_s5 + $0x48] sm:%s1964_s20] }
  0xc6   : > { %747 = vst [vmem:[%s2915_s9 + $0x20] sm:%s1964_s20] %v746_v62  ;;  %749 = vst [vmem:[%s2915_s9 + $0x30] sm:%s1964_s20] %v748_v63 }
  0xc7   : > { %v750_v0 = vld [vmem:[%s2912_s5 + $0x60] sm:%s1964_s20]  ;;  %v752_v1 = vld [vmem:[%s2912_s5 + $0x78] sm:%s1964_s20] }
  0xc8   : > { %751 = vst [vmem:[%s2915_s9 + $0x40] sm:%s1964_s20] %v750_v0  ;;  %753 = vst [vmem:[%s2915_s9 + $0x50] sm:%s1964_s20] %v752_v1 }
  0xc9   : > { %v754_v2 = vld [vmem:[%s2912_s5 + $0x90] sm:%s1964_s20]  ;;  %v756_v3 = vld [vmem:[%s2912_s5 + $0xa8] sm:%s1964_s20] }
  0xca   : > { %755 = vst [vmem:[%s2915_s9 + $0x60] sm:%s1964_s20] %v754_v2  ;;  %757 = vst [vmem:[%s2915_s9 + $0x70] sm:%s1964_s20] %v756_v3 }
  0xcb PF: > { %p1965_p1 = scmp.ge.u32.totalorder %s2772_s8, 8 }
  0xcc   : > { %s2574_s1 = smov (!%p1965_p1), 1  }
  0xcd   : > { %310 = sbr.rel (%p1965_p1) target bundleno = 218 (0xda), region = 56  ;;  %s311_s18 = sshll.u32 (!%p1965_p1), %s2574_s1, %s2772_s8 }
  0xce   : > { %s1966_s5 = sadd.s32 (!%p1965_p1), 4294967295, %s311_s18 }
  0xd2   : > { %v321_v4 = vld [vmem:[%s2770_s0] sm:%s1966_s5]  ;;  %v323_v5 = vld [vmem:[%s2770_s0 + $0x18] sm:%s1966_s5] }
  0xd3   : > { %322 = vst [vmem:[%s2774_s11] sm:%s1966_s5] %v321_v4  ;;  %324 = vst [vmem:[%s2774_s11 + $0x10] sm:%s1966_s5] %v323_v5 }
  0xd4   : > { %v325_v6 = vld [vmem:[%s2770_s0 + $0x30] sm:%s1966_s5]  ;;  %v327_v7 = vld [vmem:[%s2770_s0 + $0x48] sm:%s1966_s5] }
  0xd5   : > { %326 = vst [vmem:[%s2774_s11 + $0x20] sm:%s1966_s5] %v325_v6  ;;  %328 = vst [vmem:[%s2774_s11 + $0x30] sm:%s1966_s5] %v327_v7 }
  0xd6   : > { %v329_v8 = vld [vmem:[%s2770_s0 + $0x60] sm:%s1966_s5]  ;;  %v331_v9 = vld [vmem:[%s2770_s0 + $0x78] sm:%s1966_s5] }
  0xd7   : > { %330 = vst [vmem:[%s2774_s11 + $0x40] sm:%s1966_s5] %v329_v8  ;;  %332 = vst [vmem:[%s2774_s11 + $0x50] sm:%s1966_s5] %v331_v9 }
  0xd8   : > { %v333_v10 = vld [vmem:[%s2770_s0 + $0x90] sm:%s1966_s5]  ;;  %v335_v11 = vld [vmem:[%s2770_s0 + $0xa8] sm:%s1966_s5] }
  0xd9   : > { %334 = vst [vmem:[%s2774_s11 + $0x60] sm:%s1966_s5] %v333_v10  ;;  %336 = vst [vmem:[%s2774_s11 + $0x70] sm:%s1966_s5] %v335_v11 }
  0xda PF: > { %764 = sbr.rel (%p2680_p13) target bundleno = 802 (0x322), region = 110  ;;  %s3078_s8 = sand.u32 (!%p2680_p13), 1, %s2492_s25  }
  0xdb   : > { %s1968_s9 = sshll.u32 (!%p2680_p13), %s3078_s8, 6  ;;  %s767_s22 = scalar_lea.sflag (!%p2680_p13), [#allocation3], %s3078_s8 }
  0xdc   : > { %s3084_s0 = scalar_lea.vmem (!%p2680_p13), [#allocation2], %s1968_s9  ;;  %p3705_p3 = scmp.ne.s32.totalorder (!%p2680_p13), %s3684_s12, 0 }
  0xdf   : > { %2475 = dma.done.wait (%p3705_p3), %s767_s22, 1024  }
  0xe0   : > { %2477 = vsyncadd (%p3705_p3), %s767_s22, 4294966272  ;;  %s1969_s15 = sshll.u32 %s3078_s8, 7  ;;  %p3706_p13 = scmp.eq.s32.totalorder %s2641_s28, 0 }
  0xe1   : > { %s3091_s11 = scalar_lea.vmem [#allocation5], %s1969_s15 }
  0xe2   : > { %2479 = dma.done.wait (%p3706_p13), [#allocation7], 2048   ;;  %p3707_p7 = pmov %p3706_p13 }
  0xe3   : > { %v3675_v12 = vmov 0.0   ;;  %v2576_v13 = vmov 0   ;;  %v874_v14 = vld [vmem:[%s3091_s11 + $0x78] sm:$0xff]  ;;  %v873_v15 = vld [vmem:[%s3091_s11 + $0x70] sm:$0xff]  ;;  %v872_v16 = vld [vmem:[%s3091_s11 + $0x68] sm:$0xff]  ;;  %vm1013_vm0 = vcmask 261120  }
  0xe4   : > { %2481 = vsyncadd (%p3707_p7), [#allocation7], 4294965248  ;;  %964 = vmatprep.mubr.f32.mxu0 %v3675_v12  ;;  %1120 = vmatprep.mubr.f32.mxu1 %v3675_v12  ;;  %v871_v17 = vld [vmem:[%s3091_s11 + $0x60] sm:$0xff]  ;;  %v870_v18 = vld [vmem:[%s3091_s11 + $0x58] sm:$0xff]  ;;  %vm875_vm1 = vcmask 523264   ;;  %s3584_s18 = scalar_lea.vmem [#allocation9], %s1968_s9 }
  0xe5   : > { %2224 = vset.pattern.permute.xlu0 %v2576_v13  ;;  %2225 = vset.pattern.permute.xlu1 %v2576_v13  ;;  %v869_v19 = vld [vmem:[%s3091_s11 + $0x50] sm:$0xff]  ;;  %v868_v20 = vld [vmem:[%s3091_s11 + $0x48] sm:$0xff]  ;;  %v867_v21 = vld [vmem:[%s3091_s11 + $0x40] sm:$0xff]  ;;  %s1713_s9 = scalar_lea.sflag [#allocation4], %s3078_s8  ;;  %p3733_p9 = scmp.ne.s32.totalorder %s3685_s13, 0 }
  0xe6   : > { %916 = vmatprep.subr.mxu0 %v874_v14  ;;  %v850_v22 = vld [vmem:[%s3084_s0 + $0x38] sm:$0xff]  ;;  %v849_v24 = vld [vmem:[%s3084_s0 + $0x30] sm:$0xff]  ;;  %v848_v25 = vld [vmem:[%s3084_s0 + $0x28] sm:$0xff]  ;;  %s1998_s5 = sshll.u32 (%p3733_p9), %s2641_s28, 1 }
  0xe7   : > { %917 = vmatpush1.msra.mxu0 %v873_v15  ;;  %v866_v23 = vld [vmem:[%s3091_s11 + $0x38] sm:$0xff]  ;;  %2018 = vmatprep.subr.mxu1 %v850_v22  ;;  %v865_v26 = vld [vmem:[%s3091_s11 + $0x30] sm:$0xff]  ;;  %v847_v27 = vld [vmem:[%s3084_s0 + $0x20] sm:$0xff]  ;;  %s1721_s22 = ssub.s32 (%p3733_p9), 3, %s1998_s5 }
  0xe8   : > { %918 = vmatprep.subr.mxu0 %v872_v16  ;;  %2022 = vmatpush1.msra.mxu1 %v849_v24  ;;  %v846_v28 = vld [vmem:[%s3084_s0 + $0x18] sm:$0xff]  ;;  %v864_v29 = vld [vmem:[%s3091_s11 + $0x28] sm:$0xff]  ;;  %v845_v30 = vld [vmem:[%s3084_s0 + $0x10] sm:$0xff]  ;;  %p1722_p12 = scmp.lt.s32.totalorder (%p3733_p9), %s1721_s22, 2 }
  0xe9   : > { %919 = vmatpush1.msra.mxu0 %v871_v17  ;;  %2019 = vmatprep.subr.mxu1 %v848_v25  ;;  %v863_v31 = vld [vmem:[%s3091_s11 + $0x20] sm:$0xff]  ;;  %v844_v32 = vld [vmem:[%s3084_s0 + $0x8] sm:$0xff]  ;;  %v862_v33 = vld [vmem:[%s3091_s11 + $0x18] sm:$0xff] }
  0xea   : > { %920 = vmatprep.subr.mxu0 %v870_v18  ;;  %2023 = vmatpush1.msra.mxu1 %v847_v27  ;;  %v843_v34 = vld [vmem:[%s3084_s0] sm:$0xff]  ;;  %v861_v35 = vld [vmem:[%s3091_s11 + $0x10] sm:$0xff]  ;;  %v838_v36 = vld [vmem:[%s3664_s2 + $0x18] sm:$0xff] }
  0xeb   : > { %921 = vmatpush1.msra.mxu0 %v869_v19  ;;  %2020 = vmatprep.subr.mxu1 %v846_v28  ;;  %v860_v37 = vld [vmem:[%s3091_s11 + $0x8] sm:$0xff]  ;;  %v859_v38 = vld [vmem:[%s3091_s11] sm:$0xff]  ;;  %v1158_v39 = vld [vmem:[%s3666_s4 + $0x38] sm:$0xff] }
  0xec   : > { %922 = vmatprep.subr.mxu0 %v868_v20  ;;  %2024 = vmatpush1.msra.mxu1 %v845_v30  ;;  %v851_v40 = vld [vmem:[#allocation6] sm:$0xff]  ;;  %v852_v42 = vld [vmem:[#allocation6 + $0x8] sm:$0xff]  ;;  %v853_v44 = vld [vmem:[#allocation6 + $0x10] sm:$0xff] }
  0xed   : > { %923 = vmatpush1.msra.mxu0 %v867_v21  ;;  %2021 = vmatprep.subr.mxu1 %v844_v32  ;;  %v839_v41 = vld [vmem:[%s3664_s2 + $0x20] sm:$0xff]  ;;  %v840_v43 = vld [vmem:[%s3664_s2 + $0x28] sm:$0xff]  ;;  %v1157_v45 = vld [vmem:[%s3666_s4 + $0x30] sm:$0xff] }
  0xee   : > { %924 = vmatprep.subr.mxu0 %v866_v23  ;;  %2025 = vmatpush1.msra.mxu1 %v843_v34  ;;  %v1156_v46 = vld [vmem:[%s3666_s4 + $0x28] sm:$0xff]  ;;  %v841_v47 = vld [vmem:[%s3664_s2 + $0x30] sm:$0xff]  ;;  %v854_v48 = vld [vmem:[#allocation6 + $0x18] sm:$0xff] }
  0xef   : > { %925 = vmatpush1.msra.mxu0 %v865_v26  ;;  %1984 = vmatmul.mubr.msk.f32.vlgmr.msra.gmra.mxu1 %vm1013_vm0, %v838_v36  ;;  %v1154_v49 = vld [vmem:[%s3666_s4 + $0x18] sm:$0xff]  ;;  %v1155_v50 = vld [vmem:[%s3666_s4 + $0x20] sm:$0xff]  ;;  %v1152_v53 = vld [vmem:[%s3666_s4 + $0x8] sm:$0xff] }
  0xf0   : > { %926 = vmatprep.subr.mxu0 %v864_v29  ;;  %1126 = vmatprep.mubr.f32.mxu1 %v3675_v12  ;;  %v842_v51 = vld [vmem:[%s3664_s2 + $0x38] sm:$0xff]  ;;  %v855_v52 = vld [vmem:[#allocation6 + $0x20] sm:$0xff]  ;;  %v1153_v54 = vld [vmem:[%s3666_s4 + $0x10] sm:$0xff] }
  0xf1   : > { %927 = vmatpush1.msra.mxu0 %v863_v31  ;;  %1196 = vperm.xlu0 %2224, %v1158_v39   ;;  %v856_v55 = vld [vmem:[#allocation6 + $0x28] sm:$0xff]  ;;  %v1511_v56 = vld [vmem:[%s3668_s6] sm:$0xff]  ;;  %v857_v58 = vld [vmem:[#allocation6 + $0x30] sm:$0xff] }
  0xf2   : > { %928 = vmatprep.subr.mxu0 %v862_v33  ;;  %1186 = vperm.xlu1 %2225, %v1156_v46   ;;  %v1151_v57 = vld [vmem:[%s3666_s4] sm:$0xff]  ;;  %v1513_v59 = vld [vmem:[%s3668_s6 + $0x10] sm:$0xff]  ;;  %v1512_v60 = vld [vmem:[%s3668_s6 + $0x8] sm:$0xff] }
  0xf3   : > { %929 = vmatpush1.msra.mxu0 %v861_v35  ;;  %1985 = vmatmul.mubr.msk.f32.gmra.mxu1 %vm1013_vm0, %v839_v41  ;;  %v858_v61 = vld [vmem:[#allocation6 + $0x38] sm:$0xff]  ;;  %v1515_v62 = vld [vmem:[%s3668_s6 + $0x20] sm:$0xff]  ;;  %v1517_v1 = vld [vmem:[%s3668_s6 + $0x30] sm:$0xff] }
  0xf4   : > { %930 = vmatprep.subr.mxu0 %v860_v37  ;;  %1132 = vmatprep.mubr.f32.mxu1 %v3675_v12  ;;  %v1514_v63 = vld [vmem:[%s3668_s6 + $0x18] sm:$0xff]  ;;  %v835_v0 = vld [vmem:[%s3664_s2] sm:$0xff]  ;;  %v1516_v2 = vld [vmem:[%s3668_s6 + $0x28] sm:$0xff] }
  0xf5   : > { %931 = vmatpush1.msra.mxu0 %v859_v38  ;;  %1191 = vperm.xlu0 %2224, %v1157_v45   ;;  %v836_v3 = vld [vmem:[%s3664_s2 + $0x8] sm:$0xff]  ;;  %v1518_v4 = vld [vmem:[%s3668_s6 + $0x38] sm:$0xff]  ;;  %v837_v5 = vld [vmem:[%s3664_s2 + $0x10] sm:$0xff] }
  0xf6   : > { %1973 = vmatmul.mubr.msk.f32.vlgmr.msra.gmra.mxu0 %vm875_vm1, %v851_v40  ;;  %1062 = vmatprep.subr.mxu0 %v850_v22 }
  0xf7   : > { %970 = vmatprep.mubr.f32.mxu0 %v3675_v12  ;;  %1063 = vmatpush1.msra.mxu0 %v849_v24 }
  0xf8   : > { %1064 = vmatprep.subr.mxu0 %v848_v25  ;;  %1986 = vmatmul.mubr.msk.f32.gmra.mxu1 %vm1013_vm0, %v840_v43 }
  0xf9   : > { %1065 = vmatpush1.msra.mxu0 %v847_v27  ;;  %1138 = vmatprep.mubr.f32.mxu1 %v3675_v12 }
  0xfa   : > { %1974 = vmatmul.mubr.msk.f32.gmra.mxu0 %vm875_vm1, %v852_v42  ;;  %1066 = vmatprep.subr.mxu0 %v846_v28 }
  0xfb   : > { %976 = vmatprep.mubr.f32.mxu0 %v3675_v12  ;;  %1067 = vmatpush1.msra.mxu0 %v845_v30 }
  0xfc   : > { %1068 = vmatprep.subr.mxu0 %v844_v32  ;;  %1987 = vmatmul.mubr.msk.f32.gmra.mxu1 %vm1013_vm0, %v841_v47 }
  0xfd   : > { %1069 = vmatpush1.msra.mxu0 %v843_v34  ;;  %1144 = vmatprep.mubr.f32.mxu1 %v3675_v12 }
  0xfe   : > { %1975 = vmatmul.mubr.msk.f32.gmra.mxu0 %vm875_vm1, %v853_v44  ;;  %1176 = vperm.xlu0 %2224, %v1154_v49  }
  0xff   : > { %982 = vmatprep.mubr.f32.mxu0 %v3675_v12  ;;  %1181 = vperm.xlu1 %2225, %v1155_v50  }
 0x100   : > { %1988 = vmatmul.mubr.msk.f32.gmra.mxu1 %vm1013_vm0, %v842_v51 }
 0x101   : > { %1647 = vmatprep.mubr.f32.mxu1 %v3675_v12 }
 0x102   : > { %1976 = vmatmul.mubr.msk.f32.gmra.mxu0 %vm875_vm1, %v854_v48  ;;  %1166 = vperm.xlu0 %2224, %v1152_v53  }
 0x103   : > { %988 = vmatprep.mubr.f32.mxu0 %v3675_v12  ;;  %1171 = vperm.xlu1 %2225, %v1153_v54  }
 0x106   : > { %1977 = vmatmul.mubr.msk.f32.gmra.mxu0 %vm875_vm1, %v855_v52  ;;  %1521 = vperm.xlu0 %2224, %v1511_v56  }
 0x107   : > { %994 = vmatprep.mubr.f32.mxu0 %v3675_v12  ;;  %1161 = vperm.xlu1 %2225, %v1151_v57  }
 0x10a   : > { %1978 = vmatmul.mubr.msk.f32.gmra.mxu0 %vm875_vm1, %v856_v55  ;;  %1531 = vperm.xlu0 %2224, %v1513_v59  }
 0x10b   : > { %1000 = vmatprep.mubr.f32.mxu0 %v3675_v12  ;;  %1526 = vperm.xlu1 %2225, %v1512_v60  }
 0x10e   : > { %1979 = vmatmul.mubr.msk.f32.gmra.mxu0 %vm875_vm1, %v857_v58  ;;  %1541 = vperm.xlu0 %2224, %v1515_v62  }
 0x10f   : > { %1006 = vmatprep.mubr.f32.mxu0 %v3675_v12  ;;  %1536 = vperm.xlu1 %2225, %v1514_v63  }
 0x112   : > { %1980 = vmatmul.mubr.msk.f32.gmra.mxu0 %vm875_vm1, %v858_v61  ;;  %1551 = vperm.xlu0 %2224, %v1517_v1  }
 0x113   : > { %1102 = vmatprep.mubr.f32.mxu0 %v3675_v12  ;;  %1546 = vperm.xlu1 %2225, %v1516_v2  }
 0x116   : > { %1981 = vmatmul.mubr.msk.f32.vlgmr.msra.gmra.mxu0 %vm1013_vm0, %v835_v0 }
 0x117   : > { %1108 = vmatprep.mubr.f32.mxu0 %v3675_v12  ;;  %1556 = vperm.xlu1 %2225, %v1518_v4  }
 0x11a   : > { %1982 = vmatmul.mubr.msk.f32.gmra.mxu0 %vm1013_vm0, %v836_v3 }
 0x11b   : > { %1114 = vmatprep.mubr.f32.mxu0 %v3675_v12 }
 0x11e   : > { %1983 = vmatmul.mubr.msk.f32.gmra.mxu0 %vm1013_vm0, %v837_v5 }
 0x16c   : > { %v3228_v9 = vpop.permute.xlu0 %1196 }
 0x16d   : > { %v1187_v22 = vpop.permute.xlu1 %1186 }
 0x170   : > { %v1192_v16 = vpop.permute.xlu0 %1191 }
 0x179   : > { %v1177_v24 = vpop.permute.xlu0 %1176 }
 0x17a   : > { %v1182_v34 = vpop.permute.xlu1 %1181 }
 0x17e   : > { %v3260_v0 = vpop.permute.xlu1 %1171 }
 0x1af   : > { %v1122_v6 = vpop.f32.mrf.mxu1 }
 0x1b1   : > { %v1124_v7 = vpop.f32.mrf.mxu1 }
 0x1b3   : > { %v1128_v11 = vpop.f32.mrf.mxu1 }
 0x1b5   : > { %v1130_v14 = vpop.f32.mrf.mxu1 }
 0x1b6   : > { %v3226_v8 = vpop.f32.mrf.mxu0 }
 0x1b8   : > { %v3230_v10 = vpop.f32.mrf.mxu0  ;;  %v1134_v18 = vpop.f32.mrf.mxu1 }
 0x1ba   : > { %v3232_v13 = vpop.f32.mrf.mxu0  ;;  %v1136_v21 = vpop.f32.mrf.mxu1 }
 0x1bc   : > { %v3234_v15 = vpop.f32.mrf.mxu0  ;;  %v1140_v29 = vpop.f32.mrf.mxu1 }
 0x1be   : > { %v3236_v17 = vpop.f32.mrf.mxu0  ;;  %v1142_v39 = vpop.f32.mrf.mxu1 }
 0x1c0   : > { %v3238_v19 = vpop.f32.mrf.mxu0  ;;  %v1146_v49 = vpop.f32.mrf.mxu1 }
 0x1c2   : > { %v984_v20 = vpop.f32.mrf.mxu0  ;;  %v1148_v63 = vpop.f32.mrf.mxu1 }
 0x1c3   : > { %v1123_v23 = vadd.f32 %v1122_v6, %v984_v20 }
 0x1c4   : > { %v986_v25 = vpop.f32.mrf.mxu0 }
 0x1c5   : > { %v3240_v26 = vadd.f32 %v1177_v24, %v1123_v23  ;;  %v1125_v27 = vadd.f32 %v1124_v7, %v986_v25 }
 0x1c6   : > { %v990_v28 = vpop.f32.mrf.mxu0 }
 0x1c7   : > { %v1269_v30 = vand.u32 2147483647, %v3240_v26  ;;  %v3243_v31 = vadd.f32 %v1177_v24, %v1125_v27  ;;  %v1129_v32 = vadd.f32 %v1128_v11, %v990_v28 }
 0x1c8   : > { %v992_v33 = vpop.f32.mrf.mxu0 }
 0x1c9   : > { %v1270_v35 = vand.u32 2147483647, %v3243_v31  ;;  %v1131_v36 = vadd.f32 %v1130_v14, %v992_v33  ;;  %v3246_v37 = vadd.f32 %v1182_v34, %v1129_v32  ;;  %v1285_v40 = vsub.f32 0.0, %v1269_v30  ;;  %v1162_v32 = vpop.permute.xlu1 %1161 }
 0x1ca   : > { %v996_v38 = vpop.f32.mrf.mxu0 }
 0x1cb   : > { %v1286_v41 = vsub.f32 0.0, %v1270_v35  ;;  %v3248_v42 = vadd.f32 %v1182_v34, %v1131_v36  ;;  %v1135_v43 = vadd.f32 %v1134_v18, %v996_v38  ;;  %v1271_v45 = vand.u32 2147483647, %v3246_v37 }
 0x1cc   : > { %v998_v44 = vpop.f32.mrf.mxu0  ;;  %v1307_v50 = vmul.f32 1.442695, %v1285_v40 }
 0x1cd   : > { %v3251_v46 = vadd.f32 %v1187_v22, %v1135_v43  ;;  %v1137_v47 = vadd.f32 %v1136_v21, %v998_v44  ;;  %v1309_v52 = vmul.f32 1.442695, %v1286_v41  ;;  %v1272_v53 = vand.u32 2147483647, %v3248_v42 }
 0x1ce   : > { %v1002_v48 = vpop.f32.mrf.mxu0  ;;  %v1287_v59 = vsub.f32 0.0, %v1271_v45  ;;  %2226 = vpow2.f32 %v1307_v50  ;;  %v1167_v45 = vpop.permute.xlu0 %1166 }
 0x1cf   : > { %v1141_v51 = vadd.f32 %v1140_v29, %v1002_v48  ;;  %v1273_v54 = vand.u32 2147483647, %v3251_v46  ;;  %v3255_v55 = vadd.f32 %v1187_v22, %v1137_v47  ;;  %2228 = vpow2.f32 %v1309_v52 }
 0x1d0   : > { %v1004_v56 = vpop.f32.mrf.mxu0  ;;  %v1288_v4 = vsub.f32 0.0, %v1272_v53  ;;  %v1311_v21 = vmul.f32 1.442695, %v1287_v59  ;;  %vm1241_vm0 = vcmp.ne.f32.partialorder %v3251_v46, %v3251_v46 }
 0x1d1   : > { %v3257_v57 = vadd.f32 %v1192_v16, %v1141_v51  ;;  %v1143_v58 = vadd.f32 %v1142_v39, %v1004_v56  ;;  %v1289_v60 = vsub.f32 0.0, %v1273_v54  ;;  %v1274_v61 = vand.u32 2147483647, %v3255_v55 }
 0x1d2   : > { %v1008_v62 = vpop.f32.mrf.mxu0  ;;  %v1313_v28 = vmul.f32 1.442695, %v1288_v4  ;;  %vm1242_vm15 = vcmp.ne.f32.partialorder %v3255_v55, %v3255_v55 }
 0x1d3   : > { %v1275_v1 = vand.u32 2147483647, %v3257_v57  ;;  %v3263_v2 = vadd.f32 %v1192_v16, %v1143_v58  ;;  %v1147_v3 = vadd.f32 %v1146_v49, %v1008_v62  ;;  %v1315_v5 = vmul.f32 1.442695, %v1289_v60 }
 0x1d4   : > { %v1290_v6 = vsub.f32 0.0, %v1274_v61  ;;  %v1010_v7 = vpop.f32.mrf.mxu0  ;;  %vm1243_vm12 = vcmp.ne.f32.partialorder %v3257_v57, %v3257_v57 }
 0x1d5   : > { %v1291_v11 = vsub.f32 0.0, %v1275_v1  ;;  %v1276_v14 = vand.u32 2147483647, %v3263_v2  ;;  %v3267_v18 = vadd.f32 %v3228_v9, %v1147_v3  ;;  %v1149_v20 = vadd.f32 %v1148_v63, %v1010_v7 }
 0x1d6   : > { %2230 = vpow2.f32 %v1315_v5  ;;  %v1317_v22 = vmul.f32 1.442695, %v1290_v6  ;;  %v1104_v23 = vpop.f32.mrf.mxu0  ;;  %v1225_v5 = vmax.f32 %v3251_v46, 0.0  ;;  %vm1244_vm11 = vcmp.ne.f32.partialorder %v3263_v2, %v3263_v2 }
 0x1d7   : > { %v1319_v24 = vmul.f32 1.442695, %v1291_v11  ;;  %v1292_v16 = vsub.f32 0.0, %v1276_v14  ;;  %v1277_v25 = vand.u32 2147483647, %v3267_v18  ;;  %v3271_v27 = vadd.f32 %v3228_v9, %v1149_v20 }
 0x1d8   : > { %2232 = vpow2.f32 %v1317_v22  ;;  %v1105_v29 = vadd.f32 %v1104_v23, %v3226_v8  ;;  %v1106_v30 = vpop.f32.mrf.mxu0  ;;  %vm1245_vm10 = vcmp.ne.f32.partialorder %v3267_v18, %v3267_v18 }
 0x1d9   : > { %2234 = vpow2.f32 %v1319_v24  ;;  %v1321_v33 = vmul.f32 1.442695, %v1292_v16  ;;  %v1293_v34 = vsub.f32 0.0, %v1277_v25  ;;  %v1278_v35 = vand.u32 2147483647, %v3271_v27 }
 0x1da   : > { %2236 = vpow2.f32 %v1311_v21  ;;  %v3275_v36 = vadd.f32 %v1162_v32, %v1105_v29  ;;  %v1107_v38 = vadd.f32 %v1106_v30, %v3230_v10  ;;  %v1110_v39 = vpop.f32.mrf.mxu0  ;;  %vm1246_vm8 = vcmp.ne.f32.partialorder %v3271_v27, %v3271_v27 }
 0x1db   : > { %2238 = vpow2.f32 %v1321_v33  ;;  %v1323_v9 = vmul.f32 1.442695, %v1293_v34  ;;  %v1294_v40 = vsub.f32 0.0, %v1278_v35  ;;  %v1111_v41 = vadd.f32 %v1110_v39, %v3232_v13  ;;  %v3287_v52 = vpop.eup %2226 }
 0x1dc   : > { %2240 = vpow2.f32 %v1313_v28  ;;  %v1263_v8 = vand.u32 2147483647, %v3275_v36  ;;  %v3280_v43 = vadd.f32 %v1162_v32, %v1107_v38  ;;  %v1112_v44 = vpop.f32.mrf.mxu0  ;;  %v3289_v56 = vpop.eup %2228  ;;  %v1229_v32 = vmax.f32 %v3267_v18, 0.0 }
 0x1dd   : > { %2242 = vpow2.f32 %v1323_v9  ;;  %v1325_v47 = vmul.f32 1.442695, %v1294_v40  ;;  %v3283_v50 = vadd.f32 %v1167_v45, %v1111_v41  ;;  %v1113_v10 = vadd.f32 %v1112_v44, %v3234_v15 }
 0x1de   : > { %v1279_v48 = vsub.f32 0.0, %v1263_v8  ;;  %v1264_v49 = vand.u32 2147483647, %v3280_v43  ;;  %v1116_v51 = vpop.f32.mrf.mxu0  ;;  %v1228_v33 = vmax.f32 %v3263_v2, 0.0  ;;  %v1227_v34 = vmax.f32 %v3257_v57, 0.0 }
 0x1df   : > { %2244 = vpow2.f32 %v1325_v47  ;;  %v1117_v13 = vadd.f32 %v1116_v51, %v3236_v17  ;;  %v1265_v62 = vand.u32 2147483647, %v3283_v50  ;;  %v3296_v15 = vadd.f32 %v1167_v45, %v1113_v10 }
 0x1e0   : > { %v1280_v53 = vsub.f32 0.0, %v1264_v49  ;;  %v1118_v54 = vpop.f32.mrf.mxu0  ;;  %v1295_v58 = vmul.f32 1.442695, %v1279_v48  ;;  %v1230_v39 = vmax.f32 %v3271_v27, 0.0  ;;  %v1381_v8 = vadd.f32 1.0, %v3287_v52 }
 0x1e1   : > { %v3292_v59 = vadd.f32 %v3260_v0, %v1117_v13  ;;  %v1119_v60 = vadd.f32 %v1118_v54, %v3238_v19  ;;  %v1281_v22 = vsub.f32 0.0, %v1265_v62  ;;  %v1266_v23 = vand.u32 2147483647, %v3296_v15 }
 0x1e2   : > { %v1297_v61 = vmul.f32 1.442695, %v1280_v53  ;;  %2246 = vpow2.f32 %v1295_v58  ;;  %v3329_v44 = vmul.f32 -0.5, %v3287_v52  ;;  %v1390_v48 = vadd.f32 1.0, %v3289_v56 }
 0x1e3   : > { %v3298_v63 = vpop.eup %2230  ;;  %v1267_v17 = vand.u32 2147483647, %v3292_v59  ;;  %v3302_v1 = vadd.f32 %v3260_v0, %v1119_v60  ;;  %v1226_v0 = vmax.f32 %v3255_v55, 0.0  ;;  %v1299_v41 = vmul.f32 1.442695, %v1281_v22 }
 0x1e4   : > { %v1417_v19 = vadd.f32 1.0, %v3298_v63  ;;  %2248 = vpow2.f32 %v1297_v61  ;;  %v1282_v45 = vsub.f32 0.0, %v1266_v23  ;;  %v1393_v13 = vmul.f32 -0.5, %v3289_v56 }
 0x1e5   : > { %v3310_v11 = vpop.eup %2232  ;;  %v1283_v14 = vsub.f32 0.0, %v1267_v17  ;;  %v1268_v20 = vand.u32 2147483647, %v3302_v1 }
 0x1e6   : > { %v3314_v21 = vpop.eup %2234  ;;  %v1426_v24 = vadd.f32 1.0, %v3310_v11  ;;  %2250 = vlog2.f32 %v1417_v19  ;;  %v1429_v61 = vmul.f32 -0.5, %v3310_v11  ;;  %v1301_v17 = vmul.f32 1.442695, %v1282_v45 }
 0x1e7   : > { %v3318_v16 = vpop.eup %2236  ;;  %v1303_v25 = vmul.f32 1.442695, %v1283_v14  ;;  %v1284_v28 = vsub.f32 0.0, %v1268_v20  ;;  %v1435_v29 = vadd.f32 1.0, %v3314_v21  ;;  %v1438_v10 = vmul.f32 -0.5, %v3314_v21 }
 0x1e8   : > { %v2239_v30 = vpop.eup %2238  ;;  %2252 = vlog2.f32 %v1426_v24  ;;  %v1399_v58 = vadd.f32 1.0, %v3318_v16  ;;  %v1420_v14 = vmul.f32 -0.5, %v3298_v63  ;;  %v1405_v3 = vand.u32 2147483647, %v3318_v16 }
 0x1e9   : > { %v3324_v35 = vpop.eup %2240  ;;  %2254 = vpow2.f32 %v1303_v25  ;;  %v1305_v38 = vmul.f32 1.442695, %v1284_v28  ;;  %v1444_v9 = vadd.f32 1.0, %v2239_v30  ;;  %v1447_v54 = vmul.f32 -0.5, %v2239_v30 }
 0x1ea   : > { %v2243_v40 = vpop.eup %2242  ;;  %2256 = vlog2.f32 %v1435_v29  ;;  %v1408_v51 = vadd.f32 1.0, %v3324_v35  ;;  %v1411_v62 = vmul.f32 -0.5, %v3324_v35  ;;  %v1450_v22 = vand.u32 2147483647, %v2239_v30 }
 0x1eb   : > { %2258 = vpow2.f32 %v1305_v38  ;;  %v1453_v47 = vadd.f32 1.0, %v2243_v40  ;;  %v1456_v60 = vmul.f32 -0.5, %v2243_v40  ;;  %v1459_v20 = vand.u32 2147483647, %v2243_v40 }
 0x1ec   : > { %v2245_v49 = vpop.eup %2244  ;;  %2260 = vlog2.f32 %v1444_v9  ;;  %v1439_v23 = vadd.f32 1.0, %v1438_v10  ;;  %v1448_v24 = vadd.f32 1.0, %v1447_v54  ;;  %v1441_v25 = vand.u32 2147483647, %v3314_v21 }
 0x1ed   : > { %v1462_v53 = vadd.f32 1.0, %v2245_v49  ;;  %2262 = vlog2.f32 %v1453_v47  ;;  %v1465_v19 = vmul.f32 -0.5, %v2245_v49  ;;  %v1432_v28 = vand.u32 2147483647, %v3310_v11 }
 0x1ee   : > { %2264 = vpow2.f32 %v1299_v41  ;;  %v1468_v38 = vand.u32 2147483647, %v2245_v49  ;;  %v1457_v9 = vadd.f32 1.0, %v1456_v60  ;;  %v1430_v41 = vadd.f32 1.0, %v1429_v61 }
 0x1ef   : > { %2266 = vlog2.f32 %v1462_v53  ;;  %v3341_v29 = vpop.eup %2246  ;;  %v1466_v47 = vadd.f32 1.0, %v1465_v19  ;;  %v1423_v53 = vand.u32 2147483647, %v3298_v63  ;;  %v1402_v10 = vmul.f32 -0.5, %v3318_v16 }
 0x1f0   : > { %2268 = vlog2.f32 %v1408_v51  ;;  %vm3347_vm2 = vcmp.lt.f32.partialorder %v1459_v20, 0.0004427343  ;;  %vm3351_vm3 = vcmp.lt.f32.partialorder %v1450_v22, 0.0004427343  ;;  %v3356_v60 = vmul.f32 %v3314_v21, %v1439_v23 }
 0x1f1   : > { %2270 = vlog2.f32 %v1399_v58  ;;  %v3343_v45 = vpop.eup %2248  ;;  %v3358_v61 = vmul.f32 %v2239_v30, %v1448_v24  ;;  %vm3360_vm4 = vcmp.lt.f32.partialorder %v1441_v25, 0.0004427343  ;;  %v1421_v19 = vadd.f32 1.0, %v1420_v14 }
 0x1f2   : > { %2272 = vlog2.f32 %v1390_v48  ;;  %v1412_v20 = vadd.f32 1.0, %v1411_v62  ;;  %v1414_v12 = vand.u32 2147483647, %v3324_v35  ;;  %vm3367_vm5 = vcmp.lt.f32.partialorder %v1468_v38, 0.0004427343 }
 0x1f3   : > { %2274 = vpow2.f32 %v1301_v17  ;;  %v2251_v51 = vpop.eup %2250  ;;  %v1458_v21 = vmul.f32 %v2243_v40, %v1457_v9  ;;  %vm3374_vm6 = vcmp.lt.f32.partialorder %v1432_v28, 0.0004427343  ;;  %v1467_v24 = vmul.f32 %v2245_v49, %v1466_v47 }
 0x1f4   : > { %2276 = vlog2.f32 %v1381_v8  ;;  %v3372_v8 = vmul.f32 %v3310_v11, %v1430_v41  ;;  %v1419_v14 = vmul.f32 0.6931472, %v2251_v51  ;;  %vm3378_vm7 = vcmp.lt.f32.partialorder %v1423_v53, 0.0004427343 }
 0x1f5   : > { %v2253_v48 = vpop.eup %2252  ;;  %v1403_v25 = vadd.f32 1.0, %v1402_v10  ;;  %v1394_v40 = vadd.f32 1.0, %v1393_v13  ;;  %v1396_v11 = vand.u32 2147483647, %v3289_v56  ;;  %v1422_v49 = vmul.f32 %v3298_v63, %v1421_v19 }
 0x1f6   : > { %v3365_v4 = vpop.eup %2254  ;;  %v3391_v41 = vmul.f32 %v3324_v35, %v1412_v20  ;;  %vm3393_vm9 = vcmp.lt.f32.partialorder %v1414_v12, 0.0004427343  ;;  %v1428_v7 = vmul.f32 0.6931472, %v2253_v48  ;;  %vm3409_vm13 = vcmp.lt.f32.partialorder %v1405_v3, 0.0004427343 }
 0x1f7   : > { %v2257_v23 = vpop.eup %2256  ;;  %v1363_v28 = vadd.f32 1.0, %v3365_v4  ;;  %v1425_v12 = vsel %vm3378_vm7, %v1422_v49, %v1419_v14  ;;  %v1404_v35 = vmul.f32 %v3318_v16, %v1403_v25  ;;  %v1395_v48 = vmul.f32 %v3289_v56, %v1394_v40 }
 0x1f8   : > { %v3382_v38 = vpop.eup %2258  ;;  %v1437_v51 = vmul.f32 0.6931472, %v2257_v23  ;;  %vm3414_vm14 = vcmp.lt.f32.partialorder %v1396_v11, 0.0004427343  ;;  %v1385_v62 = vadd.f32 1.0, %v3329_v44  ;;  %v1434_v44 = vsel %vm3374_vm6, %v3372_v8, %v1428_v7 }
 0x1f9   : > { %v2261_v9 = vpop.eup %2260  ;;  %v1372_v53 = vadd.f32 1.0, %v3382_v38  ;;  %2278 = vlog2.f32 %v1363_v28  ;;  %v1387_v56 = vand.u32 2147483647, %v3287_v52  ;;  %v1481_v54 = vadd.f32 %v1425_v12, %v1225_v5 }
 0x1fa   : > { %v2263_v13 = vpop.eup %2262  ;;  %v1446_v10 = vmul.f32 0.6931472, %v2261_v9  ;;  %v1443_v40 = vsel %vm3360_vm4, %v3356_v60, %v1437_v51  ;;  %v1366_v7 = vmul.f32 -0.5, %v3365_v4  ;;  %vm1238_vm4 = vcmp.ne.f32.partialorder %v3243_v31, %v3243_v31 }
 0x1fb   : > { %v3400_v6 = vpop.eup %2264  ;;  %v1455_v63 = vmul.f32 0.6931472, %v2263_v13  ;;  %2280 = vlog2.f32 %v1372_v53  ;;  %vm1237_vm6 = vcmp.ne.f32.partialorder %v3240_v26, %v3240_v26  ;;  %v3730_v23 = vmax.f32 %v3243_v31, 0.0 }
 0x1fc   : > { %v2267_v19 = vpop.eup %2266  ;;  %v1452_v3 = vsel %vm3351_vm3, %v3358_v61, %v1446_v10  ;;  %vm1239_vm3 = vcmp.ne.f32.partialorder %v3246_v37, %v3246_v37  ;;  %v1367_v13 = vadd.f32 1.0, %v1366_v7  ;;  %v3728_v10 = vmax.f32 %v3248_v42, 0.0 }
 0x1fd   : > { %v2269_v14 = vpop.eup %2268  ;;  %v1464_v28 = vmul.f32 0.6931472, %v2267_v19  ;;  %v1461_v16 = vsel %vm3347_vm2, %v1458_v21, %v1455_v63  ;;  %vm1240_vm2 = vcmp.ne.f32.partialorder %v3248_v42, %v3248_v42  ;;  %v1484_v5 = vadd.f32 %v1452_v3, %v1228_v33 }
 0x1fe   : > { %v2271_v25 = vpop.eup %2270  ;;  %v1410_v58 = vmul.f32 0.6931472, %v2269_v14  ;;  %v1485_v11 = vadd.f32 %v1461_v16, %v1229_v32  ;;  %v1386_v32 = vmul.f32 %v3287_v52, %v1385_v62  ;;  %v1375_v33 = vmul.f32 -0.5, %v3382_v38 }
 0x1ff   : > { %v2273_v61 = vpop.eup %2272  ;;  %v1470_v21 = vsel %vm3367_vm5, %v1467_v24, %v1464_v28  ;;  %v1401_v60 = vmul.f32 0.6931472, %v2271_v25  ;;  %v1483_v24 = vadd.f32 %v1443_v40, %v1227_v34  ;;  %vm3460_vm5 = vcmp.lt.f32.partialorder %v1387_v56, 0.0004427343 }
 0x200   : > { %v3444_v17 = vpop.eup %2274  ;;  %v1486_v8 = vadd.f32 %v1470_v21, %v1230_v39  ;;  %v1392_v22 = vmul.f32 0.6931472, %v2273_v61  ;;  %v1416_v9 = vsel %vm3393_vm9, %v3391_v41, %v1410_v58  ;;  %v1482_v34 = vadd.f32 %v1434_v44, %v1226_v0 }
 0x201   : > { %v2277_v30 = vpop.eup %2276  ;;  %v1407_v49 = vsel %vm3409_vm13, %v1404_v35, %v1401_v60  ;;  %v1501_v47 = vsel %vm1245_vm10, %v3267_v18, %v1485_v11  ;;  %v1500_v0 = vsel %vm1244_vm11, %v3263_v2, %v1484_v5  ;;  %v1480_v51 = vadd.f32 %v1416_v9, %v3728_v10 }
 0x202   : > { %v1502_v52 = vsel %vm1246_vm8, %v3271_v27, %v1486_v8  ;;  %v1383_v41 = vmul.f32 0.6931472, %v2277_v30  ;;  %v1398_v53 = vsel %vm3414_vm14, %v1395_v48, %v1392_v22  ;;  %v1378_v27 = vand.u32 2147483647, %v3382_v38 }
 0x203   : > { %1599 = vmatprep.subr.mxu1 %v1502_v52  ;;  %v1354_v18 = vadd.f32 1.0, %v3444_v17  ;;  %v1499_v12 = vsel %vm1243_vm12, %v3257_v57, %v1483_v24  ;;  %v3729_v35 = vmax.f32 %v3246_v37, 0.0  ;;  %v1376_v20 = vadd.f32 1.0, %v1375_v33 }
 0x204   : > { %1600 = vmatpush1.msra.mxu1 %v1501_v47  ;;  %v1389_v63 = vsel %vm3460_vm5, %v1386_v32, %v1383_v41  ;;  %v1369_v2 = vand.u32 2147483647, %v3365_v4  ;;  %v1498_v48 = vsel %vm1242_vm15, %v3255_v55, %v1482_v34  ;;  %v1478_v62 = vadd.f32 %v1398_v53, %v3730_v23 }
 0x205   : > { %1601 = vmatprep.subr.mxu1 %v1500_v0  ;;  %v1479_v19 = vadd.f32 %v1407_v49, %v3729_v35  ;;  %2282 = vlog2.f32 %v1354_v18  ;;  %v1345_v14 = vadd.f32 1.0, %v3400_v6  ;;  %v1497_v57 = vsel %vm1241_vm0, %v3251_v46, %v1481_v54 }
 0x206   : > { %1602 = vmatpush1.msra.mxu1 %v1499_v12  ;;  %v2279_v28 = vpop.eup %2278  ;;  %v3731_v16 = vmax.f32 %v3240_v26, 0.0  ;;  %v1220_v56 = vmax.f32 %v3302_v1, 0.0  ;;  %v1219_v55 = vmax.f32 %v3292_v59, 0.0  ;;  %v1496_v40 = vsel %vm1240_vm2, %v3248_v42, %v1480_v51 }
 0x207   : > { %1603 = vmatprep.subr.mxu1 %v1498_v48  ;;  %v1365_v44 = vmul.f32 0.6931472, %v2279_v28  ;;  %v1368_v58 = vmul.f32 %v3365_v4, %v1367_v13  ;;  %2284 = vlog2.f32 %v1345_v14  ;;  %v1495_v46 = vsel %vm1239_vm3, %v3246_v37, %v1479_v19 }
 0x208   : > { %v1477_v3 = vadd.f32 %v1389_v63, %v3731_v16  ;;  %v2281_v25 = vpop.eup %2280  ;;  %1604 = vmatpush1.msra.mxu1 %v1497_v57  ;;  %v1377_v61 = vmul.f32 %v3382_v38, %v1376_v20  ;;  %vm1370_vm7 = vcmp.lt.f32.partialorder %v1369_v2, 0.0004427343  ;;  %v1494_v42 = vsel %vm1238_vm4, %v3243_v31, %v1478_v62  ;;  %v1503_v57 = vld [vmem:[#allocation8] sm:$0xff] }
 0x209   : > { %1605 = vmatprep.subr.mxu1 %v1496_v40  ;;  %v1374_v54 = vmul.f32 0.6931472, %v2281_v25  ;;  %vm1379_vm8 = vcmp.lt.f32.partialorder %v1378_v27, 0.0004427343  ;;  %v1371_v21 = vsel %vm1370_vm7, %v1368_v58, %v1365_v44  ;;  %v1336_v4 = vadd.f32 1.0, %v3343_v45  ;;  %v1509_v25 = vld [vmem:[#allocation8 + $0x30] sm:$0xff] }
 0x20a   : > { %1606 = vmatpush1.msra.mxu1 %v1495_v46  ;;  %v1493_v37 = vsel %vm1237_vm6, %v3240_v26, %v1477_v3  ;;  %v1475_v60 = vadd.f32 %v1371_v21, %v1219_v55  ;;  %v1357_v7 = vmul.f32 -0.5, %v3444_v17  ;;  %vm1236_vm9 = vcmp.ne.f32.partialorder %v3302_v1, %v3302_v1  ;;  %v1504_v3 = vld [vmem:[#allocation8 + $0x8] sm:$0xff]  ;;  %v1510_v40 = vld [vmem:[#allocation8 + $0x38] sm:$0xff]  ;;  %v1522_v46 = vpop.permute.xlu0 %1521 }
 0x20b   : > { %1607 = vmatprep.subr.mxu1 %v1494_v42  ;;  %v1380_v11 = vsel %vm1379_vm8, %v1377_v61, %v1374_v54  ;;  %2286 = vlog2.f32 %v1336_v4  ;;  %v1327_v31 = vadd.f32 1.0, %v3341_v29  ;;  %vm1235_vm10 = vcmp.ne.f32.partialorder %v3292_v59, %v3292_v59  ;;  %v1508_v55 = vld [vmem:[#allocation8 + $0x28] sm:$0xff]  ;;  %v1527_v42 = vpop.permute.xlu1 %1526 }
 0x20c   : > { %1608 = vmatpush1.msra.mxu1 %v1493_v37  ;;  %v1476_v38 = vadd.f32 %v1380_v11, %v1220_v56  ;;  %v1348_v5 = vmul.f32 -0.5, %v3400_v6  ;;  %v1491_v26 = vsel %vm1235_vm10, %v3292_v59, %v1475_v60  ;;  %v1358_v22 = vadd.f32 1.0, %v1357_v7  ;;  %v1506_v56 = vld [vmem:[#allocation8 + $0x18] sm:$0xff] }
 0x20d   : > { %2288 = vlog2.f32 %v1327_v31  ;;  %v1360_v32 = vand.u32 2147483647, %v3444_v17  ;;  %v1339_v24 = vmul.f32 -0.5, %v3343_v45  ;;  %v1351_v39 = vand.u32 2147483647, %v3400_v6 }
 0x20e   : > { %v1492_v8 = vsel %vm1236_vm9, %v3302_v1, %v1476_v38  ;;  %v1349_v30 = vadd.f32 1.0, %v1348_v5  ;;  %v1359_v33 = vmul.f32 %v3444_v17, %v1358_v22  ;;  %v1218_v34 = vmax.f32 %v3296_v15, 0.0  ;;  %v1532_v4 = vpop.permute.xlu0 %1531 }
 0x20f   : > { %1609 = vmatprep.subr.mxu1 %v1492_v8  ;;  %vm1361_vm11 = vcmp.lt.f32.partialorder %v1360_v32, 0.0004427343  ;;  %v1330_v59 = vmul.f32 -0.5, %v3341_v29  ;;  %v1340_v53 = vadd.f32 1.0, %v1339_v24  ;;  %v1217_v13 = vmax.f32 %v3283_v50, 0.0  ;;  %v1537_v60 = vpop.permute.xlu1 %1536 }
 0x210   : > { %1610 = vmatpush1.msra.mxu1 %v1491_v26  ;;  %v1350_v47 = vmul.f32 %v3400_v6, %v1349_v30  ;;  %vm1352_vm12 = vcmp.lt.f32.partialorder %v1351_v39, 0.0004427343  ;;  %v1342_v0 = vand.u32 2147483647, %v3343_v45  ;;  %vm1234_vm13 = vcmp.ne.f32.partialorder %v3296_v15, %v3296_v15 }
 0x211   : > { %v1331_v18 = vadd.f32 1.0, %v1330_v59  ;;  %vm1233_vm14 = vcmp.ne.f32.partialorder %v3283_v50, %v3283_v50  ;;  %v1341_v12 = vmul.f32 %v3343_v45, %v1340_v53  ;;  %v1333_v35 = vand.u32 2147483647, %v3341_v29 }
 0x212   : > { %v2283_v9 = vpop.eup %2282  ;;  %v1216_v20 = vmax.f32 %v3280_v43, 0.0  ;;  %vm1343_vm15 = vcmp.lt.f32.partialorder %v1342_v0, 0.0004427343  ;;  %vm1232_vm0 = vcmp.ne.f32.partialorder %v3280_v43, %v3280_v43  ;;  %v1215_v14 = vmax.f32 %v3275_v36, 0.0  ;;  %v1542_v7 = vpop.permute.xlu0 %1541 }
 0x213   : > { %v1356_v1 = vmul.f32 0.6931472, %v2283_v9  ;;  %v1332_v62 = vmul.f32 %v3341_v29, %v1331_v18  ;;  %vm1334_vm2 = vcmp.lt.f32.partialorder %v1333_v35, 0.0004427343  ;;  %vm1231_vm3 = vcmp.ne.f32.partialorder %v3275_v36, %v3275_v36  ;;  %v1547_v24 = vpop.permute.xlu1 %1546 }
 0x214   : > { %v2285_v52 = vpop.eup %2284  ;;  %v3732_v29 = vmov 0.0  }
 0x215   : > { %v1362_v49 = vsel %vm1361_vm11, %v1359_v33, %v1356_v1  ;;  %v1347_v41 = vmul.f32 0.6931472, %v2285_v52 }
 0x216   : > { %v1474_v27 = vadd.f32 %v1362_v49, %v1218_v34 }
 0x217   : > { %v1353_v17 = vsel %vm1352_vm12, %v1350_v47, %v1347_v41  ;;  %v1552_v41 = vpop.permute.xlu0 %1551 }
 0x218   : > { %v2287_v10 = vpop.eup %2286  ;;  %v1490_v51 = vsel %vm1234_vm13, %v3296_v15, %v1474_v27  ;;  %v1473_v63 = vadd.f32 %v1353_v17, %v1217_v13 }
 0x219   : > { %1611 = vmatprep.subr.mxu1 %v1490_v51  ;;  %v1338_v6 = vmul.f32 0.6931472, %v2287_v10 }
 0x21a   : > { %v1489_v19 = vsel %vm1233_vm14, %v3283_v50, %v1473_v63  ;;  %v2289_v2 = vpop.eup %2288  ;;  %v1557_v63 = vpop.permute.xlu1 %1556 }
 0x21b   : > { %1612 = vmatpush1.msra.mxu1 %v1489_v19  ;;  %v1344_v48 = vsel %vm1343_vm15, %v1341_v12, %v1338_v6  ;;  %v1329_v23 = vmul.f32 0.6931472, %v2289_v2 }
 0x21c   : > { %v1472_v15 = vadd.f32 %v1344_v48, %v1216_v20 }
 0x21d   : > { %v1335_v28 = vsel %vm1334_vm2, %v1332_v62, %v1329_v23 }
 0x21e   : > { %v1488_v45 = vsel %vm1232_vm0, %v3280_v43, %v1472_v15  ;;  %v1471_v50 = vadd.f32 %v1335_v28, %v1215_v14  ;;  %v1505_v43 = vld [vmem:[#allocation8 + $0x10] sm:$0xff] }
 0x21f   : > { %1613 = vmatprep.subr.mxu1 %v1488_v45 }
 0x220   : > { %v1487_v16 = vsel %vm1231_vm3, %v3275_v36, %v1471_v50  ;;  %v1507_v36 = vld [vmem:[#allocation8 + $0x20] sm:$0xff] }
 0x221   : > { %1614 = vmatpush1.msra.mxu1 %v1487_v16 }
 0x222   : > { %1989 = vmatmul.mubr.msk.f32.vlgmr.msra.gmra.mxu1 %vm875_vm1, %v1503_v57 }
 0x223   : > { %1653 = vmatprep.mubr.f32.mxu1 %v3732_v29 }
 0x226   : > { %1990 = vmatmul.mubr.msk.f32.gmra.mxu1 %vm875_vm1, %v1504_v3 }
 0x227   : > { %1659 = vmatprep.mubr.f32.mxu1 %v3732_v29 }
 0x22a   : > { %1991 = vmatmul.mubr.msk.f32.gmra.mxu1 %vm875_vm1, %v1505_v43 }
 0x22b   : > { %1665 = vmatprep.mubr.f32.mxu1 %v3732_v29 }
 0x22e   : > { %1992 = vmatmul.mubr.msk.f32.gmra.mxu1 %vm875_vm1, %v1506_v56 }
 0x22f   : > { %1671 = vmatprep.mubr.f32.mxu1 %v3732_v29 }
 0x232   : > { %1993 = vmatmul.mubr.msk.f32.gmra.mxu1 %vm875_vm1, %v1507_v36 }
 0x233   : > { %1677 = vmatprep.mubr.f32.mxu1 %v3732_v29 }
 0x236   : > { %1994 = vmatmul.mubr.msk.f32.gmra.mxu1 %vm875_vm1, %v1508_v55 }
 0x237   : > { %1683 = vmatprep.mubr.f32.mxu1 %v3732_v29 }
 0x23a   : > { %1995 = vmatmul.mubr.msk.f32.gmra.mxu1 %vm875_vm1, %v1509_v25 }
 0x23b   : > { %1689 = vmatprep.mubr.f32.mxu1 %v3732_v29 }
 0x23e   : > { %1996 = vmatmul.mubr.msk.f32.gmra.mxu1 %vm875_vm1, %v1510_v40 }
 0x2e2   : > { %v1649_v44 = vpop.f32.mrf.mxu1 }
 0x2e3   : > { %v1650_v8 = vadd.f32 %v1649_v44, %v1522_v46 }
 0x2e4   : > { %v1651_v58 = vpop.f32.mrf.mxu1 }
 0x2e5   : > { %v1652_v22 = vadd.f32 %v1651_v58, %v1522_v46 }
 0x2e6   : > { %v1655_v54 = vpop.f32.mrf.mxu1 }
 0x2e7   : > { %v1656_v39 = vadd.f32 %v1655_v54, %v1527_v42 }
 0x2e8   : > { %v1657_v61 = vpop.f32.mrf.mxu1 }
 0x2e9   : > { %v1658_v34 = vadd.f32 %v1657_v61, %v1527_v42 }
 0x2ea   : > { %v1661_v21 = vpop.f32.mrf.mxu1 }
 0x2eb   : > { %v1662_v53 = vadd.f32 %v1661_v21, %v1532_v4 }
 0x2ec   : > { %v1663_v37 = vpop.f32.mrf.mxu1 }
 0x2ed   : > { %v1664_v17 = vadd.f32 %v1663_v37, %v1532_v4 }
 0x2ee   : > { %v1667_v11 = vpop.f32.mrf.mxu1 }
 0x2ef   : > { %v1668_v6 = vadd.f32 %v1667_v11, %v1537_v60 }
 0x2f0   : > { %v1669_v38 = vpop.f32.mrf.mxu1 }
 0x2f1   : > { %v1670_v20 = vadd.f32 %v1669_v38, %v1537_v60 }
 0x2f2   : > { %v1673_v31 = vpop.f32.mrf.mxu1 }
 0x2f3   : > { %v1674_v5 = vadd.f32 %v1673_v31, %v1542_v7 }
 0x2f4   : > { %v1675_v26 = vpop.f32.mrf.mxu1 }
 0x2f5   : > { %v1696_v32 = vmul.f32 %v1674_v5, %v1650_v8  ;;  %v1676_v30 = vadd.f32 %v1675_v26, %v1542_v7 }
 0x2f6   : > { %v1679_v9 = vpop.f32.mrf.mxu1 }
 0x2f7   : > { %1704 = vst [vmem:[%s3584_s18] sm:$0xff] %v1696_v32  ;;  %v1697_v1 = vmul.f32 %v1676_v30, %v1652_v22  ;;  %v1680_v33 = vadd.f32 %v1679_v9, %v1547_v24 }
 0x2f8   : > { %v1681_v52 = vpop.f32.mrf.mxu1 }
 0x2f9   : > { %1705 = vst [vmem:[%s3584_s18 + $0x8] sm:$0xff] %v1697_v1  ;;  %v1698_v59 = vmul.f32 %v1680_v33, %v1656_v39  ;;  %v1682_v49 = vadd.f32 %v1681_v52, %v1547_v24 }
 0x2fa   : > { %v1685_v47 = vpop.f32.mrf.mxu1 }
 0x2fb   : > { %1706 = vst [vmem:[%s3584_s18 + $0x10] sm:$0xff] %v1698_v59  ;;  %v1699_v27 = vmul.f32 %v1682_v49, %v1658_v34  ;;  %v1686_v13 = vadd.f32 %v1685_v47, %v1552_v41 }
 0x2fc   : > { %v1687_v0 = vpop.f32.mrf.mxu1 }
 0x2fd   : > { %1707 = vst [vmem:[%s3584_s18 + $0x18] sm:$0xff] %v1699_v27  ;;  %v1700_v10 = vmul.f32 %v1686_v13, %v1662_v53  ;;  %v1688_v51 = vadd.f32 %v1687_v0, %v1552_v41 }
 0x2fe   : > { %v1691_v18 = vpop.f32.mrf.mxu1 }
 0x2ff   : > { %1708 = vst [vmem:[%s3584_s18 + $0x20] sm:$0xff] %v1700_v10  ;;  %v1701_v12 = vmul.f32 %v1688_v51, %v1664_v17  ;;  %v1692_v35 = vadd.f32 %v1691_v18, %v1557_v63 }
 0x300   : > { %v1693_v19 = vpop.f32.mrf.mxu1 }
 0x301   : > { %1709 = vst [vmem:[%s3584_s18 + $0x28] sm:$0xff] %v1701_v12  ;;  %v1702_v2 = vmul.f32 %v1692_v35, %v1668_v6  ;;  %v1694_v48 = vadd.f32 %v1693_v19, %v1557_v63  ;;  %1719 = sbr.rel (!%p3733_p9) target bundleno = 802 (0x322), region = 130 }
 0x303   : > { %1710 = vst [vmem:[%s3584_s18 + $0x30] sm:$0xff] %v1702_v2  ;;  %v1703_v15 = vmul.f32 %v1694_v48, %v1670_v20 }
 0x305   : > { %1711 = vst [vmem:[%s3584_s18 + $0x38] sm:$0xff] %v1703_v15 }
 0x306   : > { %s3754_s22 = smov (!%p1722_p12, %s1721_s22), 2 }
 0x307   : > { %s3601_s0 = sshll.u32 %s3754_s22, 9 }
 0x308   : > { %s1726_s15 = ssub.s32 1024, %s3601_s0 }
 0x309   : > { %1727 = vsyncadd %s1713_s9, %s1726_s15  ;;  %p2000_p4 = scmp.ne.s32.totalorder %s3601_s0, 0  ;;  %s2015_s13 = sshll.u32 %s2641_s28, 8 }
 0x30a   : > { %s3611_s10 = scalar_lea.hbm %s3669_s7, %s2015_s13  ;;  %s2002_s23 = sshll.u32 %s3754_s22, 3 }
 0x30b   : > { %s1733_s19 = sshll.u32 %s3584_s18, 4  ;;  %s2577_s17 = smov [#allocation9]   ;;  %s3615_s19 = int_to_ptr.vmem [resolvable:$true] %s1733_s19 }
 0x30c   : > { %s2368_s3 = scalar_lea.vmem %s3615_s19, %s3601_s0  ;;  %s2372_s16 = sshll.u32 %s2577_s17, 4  ;;  %s2373_s16 = int_to_ptr.vmem [resolvable:$false] %s2372_s16 }
 0x30d   : > { %p2369_p11 = scmp.ne.s32.totalorder %s3615_s19, %s2368_s3  ;;  %s2374_s28 = scalar_lea.vmem %s2373_s16, 2048 }
 0x30e   : > { %p2375_p8 = scmp.lt.s32.totalorder %s3615_s19, %s2373_s16  ;;  %p2376_p5 = scmp.lt.s32.totalorder %s2374_s28, %s2368_s3 }
 0x30f   : > { %p2370_p2 = pnand %p2369_p11, %p2000_p4 }
 0x310   : > { %p2377_p6 = por %p2376_p5, %p2375_p8 }
 0x311   : > { %p2371_p10 = pneg %p2370_p2 }
 0x313   : > { %p2378_p0 = pnand %p2377_p6, %p2371_p10 }
 0x315   : > { %2381 = shalt.err (!%p2378_p0)
}
 0x316   : > { %s2382_s29 = scalar_lea.hbm %s3611_s10, %s3601_s0  ;;  %s2386_s20 = scalar_lea.hbm %s3669_s7, 1536 }
 0x317   : > { %p2383_p1 = scmp.ne.s32.totalorder %s3611_s10, %s2382_s29  ;;  %p2387_p7 = scmp.lt.s32.totalorder %s3611_s10, %s3669_s7 }
 0x318   : > { %p2388_p9 = scmp.lt.s32.totalorder %s2386_s20, %s2382_s29 }
 0x319   : > { %p2384_p3 = pnand %p2383_p1, %p2000_p4 }
 0x31a   : > { %p2389_p12 = por %p2388_p9, %p2387_p7 }
 0x31b   : > { %p2385_p13 = pneg %p2384_p3 }
 0x31d   : > { %p2390_p11 = pnand %p2389_p12, %p2385_p13 }
 0x31f   : > { %2393 = shalt.err (!%p2390_p11)
}
 0x320   : > { %s2578_s5 = smov 256   ;;  %s2579_s15 = smov 384  }
 0x321   : > { %1739 = dma.vmem_to_hbm [thread:$0]  (%p2000_p4), %s3615_s19, %s3601_s0, %s3611_s10, %s1713_s9, %s2578_s5, %s2579_s15, %s2002_s23  }
 0x322 PF: > { %s1748_s13 = sand.u32 1, %s2488_s24   ;;  %p3734_p2 = scmp.ne.s32.totalorder %s3686_s14, 0 }
 0x323   : > { %p3735_p10 = scmp.ge.s32.totalorder %s2500_s27, 2  ;;  %s1749_s11 = scalar_lea.sflag [#allocation4], %s1748_s13 }
 0x325   : > { %p2044_p8 = pnand %p3735_p10, %p3734_p2 }
 0x327   : > { %p2045_p5 = pneg %p2044_p8 }
 0x329   : > { %2483 = dma.done.wait (%p2045_p5), %s1749_s11, 1024  }
 0x32a   : > { %2485 = vsyncadd (%p2045_p5), %s1749_s11, 4294966272  ;;  %s3736_s27 = sld [smem:[#allocation13_spill]]  ;;  %s3738_s24 = smov %s2492_s25 }
 0x32b   : > { %s3737_s12 = sld [smem:[#allocation14_spill]]  ;;  %s3739_s25 = smov %s2496_s26 }
 0x330   : > { %p21_p6 = scmp.ge.s32.totalorder %s3736_s27, 4  }
 0x331   : > { %s3740_s26 = smov %s3737_s12 }
 0x332   :  { %23 = sbr.rel (!%p21_p6) target bundleno = 11 (0xb), region = 237 }
 0x337   :  { %1754 = vsyncpa [#allocation3], 1 }
 0x338   :  { %1756 = vsyncpa [#allocation3 + $0x1], 1 }
 0x339   :  { %1757 = vsyncpa [#allocation7], 1 }
 0x33a   :  { %1758 = vsyncpa [#allocation4], 1 }
 0x33b   :  { %1760 = vsyncpa [#allocation4 + $0x1], 1 }

</bundles_post_ra>
